<compile_context>
chip_gen: v7x
topology: tpu7x:2x2x1
jax: 0.10.0
libtpu: 0.0.40
codegen_flags: <defaults>
</compile_context>

<pallas_src>
import functools

import numpy as np
import jax
import jax.numpy as jnp
from jax.experimental import pallas as pl
from jax.experimental.pallas import tpu as pltpu


# ---------------------------------------------------------------------------
# Kernel: one grid step = (batch item, tile of TC channels).
#   x_ref    : (1, TC*Do, 2*H*W)  input block; lanes = [even-depth plane | odd-depth plane]
#   pool_ref : (H*W, Ho*Wo)       0 / 0.125 in-plane 2x2 pooling matrix
#   o_ref    : (1, TC*Do, Ho*Wo)  output block
# ---------------------------------------------------------------------------
def _avgpool2x2x2_kernel(x_ref, pool_ref, o_ref, *, hw, precision):
    s = x_ref[0, :, :hw] + x_ref[0, :, hw:]          # depth-pair sum (VPU)
    o = jnp.dot(s, pool_ref[...],                    # in-plane 2x2 pool: one big MXU op
                preferred_element_type=jnp.float32,
                precision=precision)
    # Note: output is 1/8 of total HBM traffic, so a <128-lane last dim here costs little.
    o_ref[0] = o.astype(o_ref.dtype)                 # single contiguous store


# ---------------------------------------------------------------------------
# Host-side helpers
# ---------------------------------------------------------------------------
def _plane_pool_matrix(h, w, ho, wo):
    """(H*W, Ho*Wo) matrix with 0.125 where (h//2, w//2) == (ho, wo), else 0.
    Rows for odd tails (h >= 2*ho, w >= 2*wo) stay zero -> AvgPool3d floor behaviour."""
    m = np.zeros((h * w, ho * wo), np.float32)
    hh, ww = np.meshgrid(np.arange(2 * ho), np.arange(2 * wo), indexing="ij")
    m[(hh * w + ww).ravel(), ((hh // 2) * wo + (ww // 2)).ravel()] = 0.125
    return m


def _vmem_capacity_bytes():
    try:
        return int(getattr(pltpu.get_tpu_info(), "vmem_capacity_bytes", 64 << 20))
    except Exception:
        return 64 << 20          # conservative (v7x per-TC VMEM)


def _pick_channel_tile(c, do, per_channel_bytes, budget_bytes, batch, sublane):
    def ok(t):   # block's second-to-last dim: multiple of the native sublane tile, or full
        return t == c or (t * do) % sublane == 0
    divs = [t for t in range(1, c + 1) if c % t == 0 and ok(t)]
    fits = [t for t in divs if t * per_channel_bytes <= budget_bytes]
    tc = max(fits) if fits else min(divs)
    # keep >= 2 grid steps so v7x's two TensorCores both get work
    if batch * (c // tc) < 2:
        smaller = [t for t in (fits or divs) if c // t >= 2]
        if smaller:
            tc = max(smaller)
    return tc


# ---------------------------------------------------------------------------
# Forward pass
# ---------------------------------------------------------------------------
@functools.partial(jax.jit, static_argnames=("channel_tile",))
def transition_forward(x, *, channel_tile=None):
    """AvgPool3d(kernel_size=2, stride=2) on NCDHW input via a Pallas TPU kernel."""
    B, C, D, H, W = x.shape
    Do, Ho, Wo = D // 2, H // 2, W // 2
    assert Do >= 1 and Ho >= 1 and Wo >= 1, "spatial dims must be >= 2"

    if D != 2 * Do:
        # TODO(synk): fold odd-D handling into the kernel to avoid this one HBM copy.
        x = x[:, :, :2 * Do]
        D = 2 * Do

    dtype = x.dtype
    itemsize = jnp.dtype(dtype).itemsize
    hw, howo = H * W, Ho * Wo

    # Free row-major reshape: each depth pair's (even | odd) planes land on the lane axis.
    x3 = x.reshape(B, C * Do, 2 * hw)

    vmem_cap = _vmem_capacity_bytes()
    pool_bytes = hw * howo * itemsize
    # Input-block budget: big enough for the HBM roofline, small enough that
    # 2x double-buffered in/out blocks + the pool matrix fit every generation's VMEM.
    in_budget = min(8 << 20, max(1 << 20, (vmem_cap // 2 - 2 * pool_bytes) // 3))
    sublane = 8 * max(1, 4 // itemsize)          # 8 (f32) / 16 (bf16) / 32 (int8)
    per_channel = 2 * Do * hw * itemsize

    TC = channel_tile if channel_tile is not None else _pick_channel_tile(
        C, Do, per_channel, in_budget, B, sublane)
    assert C % TC == 0, (C, TC)

    pool = jnp.asarray(_plane_pool_matrix(H, W, Ho, Wo), dtype=dtype)

    in_block = TC * Do * 2 * hw * itemsize
    out_block = TC * Do * howo * itemsize
    vmem_limit = int(min(max(2 * (in_block + out_block + pool_bytes) + (4 << 20),
                             32 << 20),
                         int(0.9 * vmem_cap)))

    precision = (jax.lax.Precision.HIGHEST if dtype == jnp.float32
                 else jax.lax.Precision.DEFAULT)

    out = pl.pallas_call(
        functools.partial(_avgpool2x2x2_kernel, hw=hw, precision=precision),
        out_shape=jax.ShapeDtypeStruct((B, C * Do, howo), dtype),
        grid=(B, C // TC),
        in_specs=[
            pl.BlockSpec((1, TC * Do, 2 * hw), lambda b, c: (b, c, 0)),
            pl.BlockSpec((hw, howo), lambda b, c: (0, 0)),
        ],
        out_specs=pl.BlockSpec((1, TC * Do, howo), lambda b, c: (b, c, 0)),
        compiler_params=pltpu.CompilerParams(
            dimension_semantics=("parallel", "parallel"),
            vmem_limit_bytes=vmem_limit),
    )(x3, pool)

    return out.reshape(B, C, Do, Ho, Wo)          # free reshape back


# ---------------------------------------------------------------------------
# Pure-JAX reference (matches nn.AvgPool3d(kernel_size=2, stride=2)).
# ---------------------------------------------------------------------------
def reference_forward(x):
    B, C, D, H, W = x.shape
    Do, Ho, Wo = D // 2, H // 2, W // 2
    xr = x[:, :, :2 * Do, :2 * Ho, :2 * Wo].reshape(B, C, Do, 2, Ho, 2, Wo, 2)
    return xr.mean(axis=(3, 5, 7))


if __name__ == "__main__":
    key = jax.random.PRNGKey(0)

    # Even dims, f32 (exact path).
    B, C, D, H, W = 2, 16, 16, 16, 16
    x = jax.random.normal(key, (B, C, D, H, W), jnp.float32)
    out = jax.block_until_ready(transition_forward(x))
    assert out.shape == (B, C, D // 2, H // 2, W // 2), out.shape
    ref = jax.block_until_ready(reference_forward(x))
    np.testing.assert_allclose(np.asarray(out), np.asarray(ref), rtol=1e-5, atol=1e-5)

    # Native-bf16 path: no host up/down casts, MXU accumulates in f32.
    xb = x.astype(jnp.bfloat16)
    out_b = jax.block_until_ready(transition_forward(xb))
    assert out_b.dtype == jnp.bfloat16
    np.testing.assert_allclose(np.asarray(out_b.astype(jnp.float32)), np.asarray(ref),
                               rtol=5e-2, atol=5e-2)

    # Odd spatial dims: floor behaviour (zero rows in the pool matrix + depth slice).
    x2 = jax.random.normal(jax.random.PRNGKey(1), (1, 8, 9, 11, 6), jnp.float32)
    out2 = jax.block_until_ready(transition_forward(x2))
    ref2 = jax.block_until_ready(reference_forward(x2))
    assert out2.shape == (1, 8, 4, 5, 3), out2.shape
    np.testing.assert_allclose(np.asarray(out2), np.asarray(ref2), rtol=1e-5, atol=1e-5)

    print("KERNEL_OK")
</pallas_src>

<mosaic_0001>
module attributes {stable_mosaic.version = 11 : i64} {
  func.func @_avgpool2x2x2_kernel(%arg0: i32, %arg1: i32, %arg2: memref<1x128x512xf32, #tpu.memory_space<vmem>>, %arg3: memref<256x64xf32, #tpu.memory_space<vmem>>, %arg4: memref<1x128x64xf32, #tpu.memory_space<vmem>>) attributes {dimension_semantics = [#tpu.dimension_semantics<parallel>, #tpu.dimension_semantics<parallel>], iteration_bounds = array<i64: 2, 1>, scalar_prefetch = 0 : i64, scratch_operands = 0 : i64, tpu.core_type = #tpu.core_type<tc>, window_params = [{transform_indices = @transform_0, window_bounds = array<i64: 1, 128, 512>}, {pipeline_mode = #tpu.pipeline_mode<synchronous>, transform_indices = @transform_1, window_bounds = array<i64: 256, 64>}, {transform_indices = @transform_2, window_bounds = array<i64: 1, 128, 64>}]} {
    %c0 = arith.constant 0 : index
    %c0_0 = arith.constant 0 : index
    %c0_1 = arith.constant 0 : index
    %0 = vector.load %arg2[%c0, %c0_0, %c0_1] : memref<1x128x512xf32, #tpu.memory_space<vmem>>, vector<1x128x256xf32>
    %1 = vector.shape_cast %0 : vector<1x128x256xf32> to vector<128x256xf32>
    %c0_2 = arith.constant 0 : index
    %c0_3 = arith.constant 0 : index
    %c256 = arith.constant 256 : index
    %2 = vector.load %arg2[%c0_2, %c0_3, %c256] : memref<1x128x512xf32, #tpu.memory_space<vmem>>, vector<1x128x256xf32>
    %3 = vector.shape_cast %2 : vector<1x128x256xf32> to vector<128x256xf32>
    %4 = arith.addf %1, %3 : vector<128x256xf32>
    %c0_4 = arith.constant 0 : index
    %c0_5 = arith.constant 0 : index
    %5 = vector.load %arg3[%c0_4, %c0_5] : memref<256x64xf32, #tpu.memory_space<vmem>>, vector<256x64xf32>
    %cst = arith.constant dense<0.000000e+00> : vector<128x64xf32>
    %6 = tpu.matmul %4, %5, %cst {dimension_numbers = #tpu.dot_dimension_numbers<[1], [0], [0], [1], [0, 0, 1, 1], [], []>, precision = #tpu.contract_precision<fp32>} : vector<128x256xf32>, vector<256x64xf32>, vector<128x64xf32> -> vector<128x64xf32>
    %c0_6 = arith.constant 0 : index
    %c0_7 = arith.constant 0 : index
    %c0_8 = arith.constant 0 : index
    %7 = vector.load %arg4[%c0_6, %c0_7, %c0_8] : memref<1x128x64xf32, #tpu.memory_space<vmem>>, vector<1x128x64xf32>
    %8 = vector.shape_cast %7 : vector<1x128x64xf32> to vector<128x64xf32>
    %9 = vector.shape_cast %6 : vector<128x64xf32> to vector<1x128x64xf32>
    tpu.vector_store %arg4[%c0_6, %c0_7, %c0_8], %9 {strides = array<i32>} : memref<1x128x64xf32, #tpu.memory_space<vmem>>, vector<1x128x64xf32>,
    return
  }
  func.func @transform_0(%arg0: i32, %arg1: i32) -> (i32, i32, i32) {
    %c0_i32 = arith.constant 0 : i32
    %c0_i32_0 = arith.constant 0 : i32
    return %arg0, %arg1, %c0_i32 : i32, i32, i32
  }
  func.func @transform_1(%arg0: i32, %arg1: i32) -> (i32, i32) {
    %c0_i32 = arith.constant 0 : i32
    %c0_i32_0 = arith.constant 0 : i32
    %c0_i32_1 = arith.constant 0 : i32
    return %c0_i32, %c0_i32_0 : i32, i32
  }
  func.func @transform_2(%arg0: i32, %arg1: i32) -> (i32, i32, i32) {
    %c0_i32 = arith.constant 0 : i32
    %c0_i32_0 = arith.constant 0 : i32
    return %arg0, %arg1, %c0_i32 : i32, i32, i32
  }
}

</mosaic_0001>

<bundles_post_ra>
// kernel: transition_forward.1
= control target key start
LH: loop header
LB: loop body
LE: loop exit
PB: predicated region body
PF: predicated region fallthrough
CT: control target
= control target key end

     0   :  { %s2871_s9 = smov 0   ;;  %s2873_s10 = smov 0   ;;  %s4081_s0 = inlined_call_operand.vmem [shape: f32[2,128,512], index: 0, kind: input, shape index: {}]   ;;  %s4082_s1 = inlined_call_operand.vmem [shape: f32[256,64], index: 1, kind: input, shape index: {}]   ;;  %s4083_s2 = inlined_call_operand.vmem [shape: f32[2,128,64], index: 2, kind: output, shape index: {}]  }
   0x1   :  { %s2875_s11 = smov 0  }
   0x2 LB: > { %s24_s12 = sadd.s32 1, %s2850_s10  ;;  %p2127_p0 = scmp.ge.s32.totalorder %s2854_s11, 1  ;;  %s2854_s11 = sphi %s2875_s11, %s12_s11   ;;  %s2850_s10 = sphi %s2873_s10, %s4476_s10   ;;  %s2846_s9 = sphi %s2871_s9, %s4475_s9  }
   0x3   : > { %p26_p1 = scmp.ge.s32.totalorder %s24_s12, 2  ;;  %p134_p2 = scmp.lt.s32.totalorder %s2854_s11, 3 }
   0x5   : > { %s4478_s12 = smov (%p26_p1, %s24_s12), 0  ;;  %p135_p3 = pnand %p2127_p0, %p134_p2 }
   0x7   : > { %138 = sbr.rel (%p135_p3) target bundleno = 485 (0x1e5), region = 28 }
   0xe   : > { %v298_v0 = vld [vmem:[%s4082_s1 + $0x80] sm:$0xff]  ;;  %v299_v1 = vld [vmem:[%s4082_s1 + $0x88] sm:$0xff]  ;;  %v300_v7 = vld [vmem:[%s4082_s1 + $0x90] sm:$0xff]  ;;  %p166_p4 = scmp.lt.s32.totalorder %s2846_s9, 1  ;;  %vm2016_vm0 = vcmask 523264  }
   0xf   : > { %v282_v2 = vld [vmem:[%s4082_s1] sm:$0xff]  ;;  %v363_v3 = vand.u32 4294901760, %v298_v0  ;;  %v366_v4 = vand.u32 4294901760, %v299_v1  ;;  %v283_v5 = vld [vmem:[%s4082_s1 + $0x8] sm:$0xff]  ;;  %v301_v8 = vld [vmem:[%s4082_s1 + $0x98] sm:$0xff]  ;;  %v369_v10 = vand.u32 4294901760, %v300_v7 }
  0x10   : > { %v315_v6 = vand.u32 4294901760, %v282_v2  ;;  %v318_v9 = vand.u32 4294901760, %v283_v5  ;;  %v372_v11 = vand.u32 4294901760, %v301_v8  ;;  %v284_v12 = vld [vmem:[%s4082_s1 + $0x10] sm:$0xff]  ;;  %v285_v13 = vld [vmem:[%s4082_s1 + $0x18] sm:$0xff]  ;;  %v302_v18 = vld [vmem:[%s4082_s1 + $0xa0] sm:$0xff] }
  0x11   : > { %v2915_v14 = vpack.c.bf16 %v366_v4, %v363_v3  ;;  %v321_v16 = vand.u32 4294901760, %v284_v12  ;;  %v324_v17 = vand.u32 4294901760, %v285_v13  ;;  %v303_v19 = vld [vmem:[%s4082_s1 + $0xa8] sm:$0xff]  ;;  %v2931_v23 = vsub.f32 %v300_v7, %v369_v10  ;;  %v286_v24 = vld [vmem:[%s4082_s1 + $0x20] sm:$0xff]  ;;  %v304_v38 = vld [vmem:[%s4082_s1 + $0xb0] sm:$0xff]  ;;  %s4480_s9 = smov (!%p166_p4, %s2846_s9), 1 }
  0x12   : > { %v2917_v15 = vsub.f32 %v282_v2, %v315_v6  ;;  %v2925_v20 = vpack.c.bf16 %v318_v9, %v315_v6  ;;  %v2927_v21 = vsub.f32 %v283_v5, %v318_v9  ;;  %v2929_v22 = vpack.c.bf16 %v372_v11, %v369_v10  ;;  %v287_v25 = vld [vmem:[%s4082_s1 + $0x28] sm:$0xff]  ;;  %v305_v43 = vld [vmem:[%s4082_s1 + $0xb8] sm:$0xff]  ;;  %v288_v56 = vld [vmem:[%s4082_s1 + $0x30] sm:$0xff]  ;;  %s2134_s21 = sshll.u32 %s4480_s9, 9  ;;  %s2135_s5 = sshll.u32 %s4480_s9, 7 }
  0x13   : > { %2617 = vmatprep.subr.bf16.mxu0 %v2915_v14  ;;  %v2940_v26 = vsub.f32 %v301_v8, %v372_v11  ;;  %v2942_v27 = vpack.c.bf16 %v324_v17, %v321_v16  ;;  %v2944_v28 = vsub.f32 %v284_v12, %v321_v16  ;;  %v2946_v29 = vsub.f32 %v285_v13, %v324_v17  ;;  %v289_v57 = vld [vmem:[%s4082_s1 + $0x38] sm:$0xff]  ;;  %v306_v6 = vld [vmem:[%s4082_s1 + $0xc0] sm:$0xff]  ;;  %v307_v7 = vld [vmem:[%s4082_s1 + $0xc8] sm:$0xff]  ;;  %s3165_s30 = scalar_lea.vmem %s4081_s0, %s2134_s21  ;;  %s4023_s8 = scalar_lea.vmem %s4083_s2, %s2135_s5 }
  0x14   : > { %4258 = vst [vmem:[#allocation2_spill] sm:$0xff] %v2917_v15  ;;  %4259 = vst [vmem:[#allocation3_spill] sm:$0xff] %v2925_v20  ;;  %2619 = vmatpush3.bf16.msra.mxu0 %v2925_v20  ;;  %v375_v30 = vand.u32 4294901760, %v302_v18  ;;  %v378_v31 = vand.u32 4294901760, %v303_v19  ;;  %v2949_v32 = vsub.f32 %v298_v0, %v363_v3  ;;  %v2951_v33 = vsub.f32 %v299_v1, %v366_v4  ;;  %v290_v12 = vld [vmem:[%s4082_s1 + $0x40] sm:$0xff] }
  0x15   : > { %4260 = vst [vmem:[#allocation4_spill] sm:$0xff] %v2927_v21  ;;  %4261 = vst [vmem:[#allocation5_spill] sm:$0xff] %v2929_v22  ;;  %2621 = vmatprep.subr.bf16.mxu0 %v2929_v22  ;;  %v327_v34 = vand.u32 4294901760, %v286_v24  ;;  %v330_v35 = vand.u32 4294901760, %v287_v25  ;;  %v4101_v36 = vand.u32 4294901760, %v2917_v15  ;;  %v4100_v37 = vand.u32 4294901760, %v2927_v21 }
  0x16   : > { %4262 = vst [vmem:[#allocation6_spill] sm:$0xff] %v2951_v33  ;;  %v2959_v39 = vpack.c.bf16 %v378_v31, %v375_v30  ;;  %v2961_v40 = vsub.f32 %v302_v18, %v375_v30  ;;  %v2963_v41 = vsub.f32 %v303_v19, %v378_v31  ;;  %v4103_v42 = vand.u32 4294901760, %v2949_v32  ;;  %v291_v31 = vld [vmem:[%s4082_s1 + $0x48] sm:$0xff] }
  0x17   : > { %v4102_v44 = vand.u32 4294901760, %v2951_v33  ;;  %v2970_v45 = vpack.c.bf16 %v330_v35, %v327_v34  ;;  %v2972_v46 = vsub.f32 %v286_v24, %v327_v34  ;;  %v2974_v47 = vsub.f32 %v287_v25, %v330_v35 }
  0x18   : > { %4263 = vst [vmem:[#allocation7_spill] sm:$0xff] %v2959_v39  ;;  %4264 = vst [vmem:[#allocation8_spill] sm:$0xff] %v2963_v41  ;;  %2623 = vmatpush3.bf16.msra.mxu0 %v2942_v27  ;;  %v767_v48 = vsub.f32 %v2949_v32, %v4103_v42  ;;  %v655_v49 = vsub.f32 %v2917_v15, %v4101_v36  ;;  %v662_v50 = vsub.f32 %v2927_v21, %v4100_v37  ;;  %v187_v37 = vld [vmem:[%s3165_s30 + $0x8] sm:$0xff]  ;;  %v219_v42 = vld [vmem:[%s3165_s30 + $0x18] sm:$0xff] }
  0x19   : > { %v381_v51 = vand.u32 4294901760, %v304_v38  ;;  %2625 = vmatprep.subr.bf16.mxu0 %v2959_v39  ;;  %v774_v52 = vsub.f32 %v2951_v33, %v4102_v44  ;;  %v384_v53 = vand.u32 4294901760, %v305_v43  ;;  %v4099_v54 = vand.u32 4294901760, %v2931_v23 }
  0x1a   : > { %v4097_v55 = vand.u32 4294901760, %v2940_v26  ;;  %v768_v58 = vand.u32 4294901760, %v767_v48  ;;  %v656_v59 = vand.u32 4294901760, %v655_v49  ;;  %v663_v60 = vand.u32 4294901760, %v662_v50 }
  0x1b   : > { %v2998_v61 = vsub.f32 %v304_v38, %v381_v51  ;;  %v775_v62 = vand.u32 4294901760, %v774_v52  ;;  %v3000_v63 = vpack.c.bf16 %v384_v53, %v381_v51  ;;  %v3002_v0 = vsub.f32 %v305_v43, %v384_v53 }
  0x1c   : > { %v781_v1 = vsub.f32 %v2931_v23, %v4099_v54  ;;  %2627 = vmatpush3.bf16.msra.mxu0 %v2970_v45  ;;  %v2650_v2 = vpack.c.bf16 %v663_v60, %v656_v59  ;;  %v788_v3 = vsub.f32 %v2940_v26, %v4097_v55  ;;  %v333_v4 = vand.u32 4294901760, %v288_v56  ;;  %v309_v59 = vld [vmem:[%s4082_s1 + $0xd8] sm:$0xff] }
  0x1d   : > { %4265 = vst [vmem:[#allocation9_spill] sm:$0xff] %v3000_v63  ;;  %v336_v5 = vand.u32 4294901760, %v289_v57  ;;  %v2648_v8 = vpack.c.bf16 %v775_v62, %v768_v58  ;;  %2629 = vmatprep.subr.bf16.mxu0 %v3000_v63  ;;  %v4095_v10 = vand.u32 4294901760, %v2944_v28  ;;  %v4094_v11 = vand.u32 4294901760, %v2946_v29  ;;  %v308_v58 = vld [vmem:[%s4082_s1 + $0xd0] sm:$0xff] }
  0x1e   : > { %v782_v9 = vand.u32 4294901760, %v781_v1  ;;  %v789_v13 = vand.u32 4294901760, %v788_v3  ;;  %v3025_v17 = vsub.f32 %v288_v56, %v333_v4  ;;  %v387_v25 = vand.u32 4294901760, %v306_v6  ;;  %v292_v3 = vld [vmem:[%s4082_s1 + $0x50] sm:$0xff] }
  0x1f   : > { %v3023_v16 = vpack.c.bf16 %v336_v5, %v333_v4  ;;  %v3027_v18 = vsub.f32 %v289_v57, %v336_v5  ;;  %2649 = vmatprep.subr.bf16.mxu1 %v2648_v8  ;;  %v669_v19 = vsub.f32 %v2944_v28, %v4095_v10  ;;  %v676_v24 = vsub.f32 %v2946_v29, %v4094_v11 }
  0x20   : > { %v390_v30 = vand.u32 4294901760, %v307_v7  ;;  %2651 = vmatpush3.bf16.msra.mxu1 %v2650_v2  ;;  %v2652_v34 = vpack.c.bf16 %v789_v13, %v782_v9  ;;  %v4091_v35 = vand.u32 4294901760, %v2961_v40  ;;  %v4089_v38 = vand.u32 4294901760, %v2963_v41 }
  0x21   : > { %4266 = vst [vmem:[#allocation10_spill] sm:$0xff] %v3023_v16  ;;  %2631 = vmatpush3.bf16.msra.mxu0 %v3023_v16  ;;  %v339_v43 = vand.u32 4294901760, %v290_v12  ;;  %v670_v48 = vand.u32 4294901760, %v669_v19  ;;  %v677_v49 = vand.u32 4294901760, %v676_v24  ;;  %v3043_v51 = vsub.f32 %v306_v6, %v387_v25  ;;  %v293_v19 = vld [vmem:[%s4082_s1 + $0x58] sm:$0xff] }
  0x22   : > { %v3041_v50 = vpack.c.bf16 %v390_v30, %v387_v25  ;;  %2653 = vmatprep.subr.bf16.mxu1 %v2652_v34  ;;  %v3045_v52 = vsub.f32 %v307_v7, %v390_v30  ;;  %v795_v53 = vsub.f32 %v2961_v40, %v4091_v35  ;;  %v802_v56 = vsub.f32 %v2963_v41, %v4089_v38 }
  0x23   : > { %v342_v57 = vand.u32 4294901760, %v291_v31  ;;  %v2654_v60 = vpack.c.bf16 %v677_v49, %v670_v48  ;;  %v3060_v62 = vsub.f32 %v290_v12, %v339_v43  ;;  %v4088_v1 = vand.u32 4294901760, %v2972_v46 }
  0x24   : > { %4267 = vst [vmem:[#allocation11_spill] sm:$0xff] %v3041_v50  ;;  %2633 = vmatprep.subr.bf16.mxu0 %v3041_v50  ;;  %v4086_v2 = vand.u32 4294901760, %v2974_v47  ;;  %v796_v4 = vand.u32 4294901760, %v795_v53  ;;  %v803_v5 = vand.u32 4294901760, %v802_v56  ;;  %v393_v12 = vand.u32 4294901760, %v308_v58 }
  0x25   : > { %4268 = vst [vmem:[#allocation12_spill] sm:$0xff] %v3060_v62  ;;  %v3067_v6 = vpack.c.bf16 %v342_v57, %v339_v43  ;;  %v3069_v7 = vsub.f32 %v291_v31, %v342_v57  ;;  %2655 = vmatpush3.bf16.msra.mxu1 %v2654_v60  ;;  %v683_v8 = vsub.f32 %v2972_v46, %v4088_v1  ;;  %v396_v13 = vand.u32 4294901760, %v309_v59 }
  0x26   : > { %v690_v9 = vsub.f32 %v2974_v47, %v4086_v2  ;;  %v2656_v24 = vpack.c.bf16 %v803_v5, %v796_v4  ;;  %v4085_v25 = vand.u32 4294901760, %v2998_v61  ;;  %v4084_v30 = vand.u32 4294901760, %v3002_v0  ;;  %v310_v4 = vld [vmem:[%s4082_s1 + $0xe0] sm:$0xff] }
  0x27   : > { %4269 = vst [vmem:[#allocation13_spill] sm:$0xff] %v3067_v6  ;;  %4270 = vst [vmem:[#allocation14_spill] sm:$0xff] %v3069_v7  ;;  %2635 = vmatpush3.bf16.msra.mxu0 %v3067_v6  ;;  %v345_v31 = vand.u32 4294901760, %v292_v3  ;;  %v684_v34 = vand.u32 4294901760, %v683_v8  ;;  %v3084_v48 = vpack.c.bf16 %v396_v13, %v393_v12  ;;  %v3086_v49 = vsub.f32 %v308_v58, %v393_v12  ;;  %v311_v58 = vld [vmem:[%s4082_s1 + $0xe8] sm:$0xff]  ;;  %v294_v12 = vld [vmem:[%s4082_s1 + $0x60] sm:$0xff] }
  0x28   : > { %v691_v43 = vand.u32 4294901760, %v690_v9  ;;  %2657 = vmatprep.subr.bf16.mxu1 %v2656_v24  ;;  %v3088_v53 = vsub.f32 %v309_v59, %v396_v13  ;;  %v809_v56 = vsub.f32 %v2998_v61, %v4085_v25  ;;  %v816_v57 = vsub.f32 %v3002_v0, %v4084_v30 }
  0x29   : > { %4271 = vst [vmem:[#allocation15_spill] sm:$0xff] %v3084_v48  ;;  %4272 = vst [vmem:[#allocation16_spill] sm:$0xff] %v3086_v49  ;;  %v348_v60 = vand.u32 4294901760, %v293_v19  ;;  %2637 = vmatprep.subr.bf16.mxu0 %v3084_v48  ;;  %v3103_v59 = vsub.f32 %v292_v3, %v345_v31  ;;  %v4087_v8 = vand.u32 4294901760, %v3025_v17  ;;  %v4090_v9 = vand.u32 4294901760, %v3027_v18 }
  0x2a   : > { %4273 = vst [vmem:[#allocation17_spill] sm:$0xff] %v3088_v53  ;;  %v2658_v5 = vpack.c.bf16 %v691_v43, %v684_v34  ;;  %v810_v13 = vand.u32 4294901760, %v809_v56  ;;  %v817_v24 = vand.u32 4294901760, %v816_v57  ;;  %v399_v25 = vand.u32 4294901760, %v310_v4  ;;  %v295_v56 = vld [vmem:[%s4082_s1 + $0x68] sm:$0xff] }
  0x2b   : > { %v3115_v30 = vpack.c.bf16 %v348_v60, %v345_v31  ;;  %v3117_v34 = vsub.f32 %v293_v19, %v348_v60  ;;  %v697_v3 = vsub.f32 %v3025_v17, %v4087_v8  ;;  %v704_v43 = vsub.f32 %v3027_v18, %v4090_v9 }
  0x2c   : > { %2659 = vmatpush3.bf16.msra.mxu1 %v2658_v5  ;;  %v402_v2 = vand.u32 4294901760, %v311_v58  ;;  %v2660_v31 = vpack.c.bf16 %v817_v24, %v810_v13  ;;  %v4093_v19 = vand.u32 4294901760, %v3043_v51  ;;  %v4092_v57 = vand.u32 4294901760, %v3045_v52 }
  0x2d   : > { %4274 = vst [vmem:[#allocation18_spill] sm:$0xff] %v3115_v30  ;;  %2639 = vmatpush3.bf16.msra.mxu0 %v3115_v30  ;;  %v351_v60 = vand.u32 4294901760, %v294_v12  ;;  %v698_v5 = vand.u32 4294901760, %v697_v3  ;;  %v705_v8 = vand.u32 4294901760, %v704_v43  ;;  %v3133_v38 = vsub.f32 %v310_v4, %v399_v25  ;;  %v312_v3 = vld [vmem:[%s4082_s1 + $0xf0] sm:$0xff] }
  0x2e   : > { %v3131_v1 = vpack.c.bf16 %v402_v2, %v399_v25  ;;  %2661 = vmatprep.subr.bf16.mxu1 %v2660_v31  ;;  %v3136_v9 = vsub.f32 %v311_v58, %v402_v2  ;;  %v823_v13 = vsub.f32 %v3043_v51, %v4093_v19  ;;  %v830_v24 = vsub.f32 %v3045_v52, %v4092_v57  ;;  %v313_v25 = vld [vmem:[%s4082_s1 + $0xf8] sm:$0xff]  ;;  %v296_v31 = vld [vmem:[%s4082_s1 + $0x70] sm:$0xff] }
  0x2f   : > { %v354_v35 = vand.u32 4294901760, %v295_v56  ;;  %v2662_v4 = vpack.c.bf16 %v705_v8, %v698_v5  ;;  %v3151_v2 = vsub.f32 %v294_v12, %v351_v60  ;;  %v4096_v58 = vand.u32 4294901760, %v3060_v62 }
  0x30   : > { %4275 = vst [vmem:[#allocation19_spill] sm:$0xff] %v3131_v1  ;;  %4276 = vst [vmem:[#allocation20_spill] sm:$0xff] %v3136_v9  ;;  %2641 = vmatprep.subr.bf16.mxu0 %v3131_v1  ;;  %v4098_v43 = vand.u32 4294901760, %v3069_v7  ;;  %v824_v57 = vand.u32 4294901760, %v823_v13  ;;  %v831_v19 = vand.u32 4294901760, %v830_v24  ;;  %v405_v5 = vand.u32 4294901760, %v312_v3 }
  0x31   : > { %4277 = vst [vmem:[#allocation21_spill] sm:$0xff] %v3151_v2  ;;  %v3158_v11 = vpack.c.bf16 %v354_v35, %v351_v60  ;;  %v3160_v10 = vsub.f32 %v295_v56, %v354_v35  ;;  %2663 = vmatpush3.bf16.msra.mxu1 %v2662_v4  ;;  %v711_v8 = vsub.f32 %v3060_v62, %v4096_v58  ;;  %v408_v60 = vand.u32 4294901760, %v313_v25  ;;  %v297_v35 = vld [vmem:[%s4082_s1 + $0x78] sm:$0xff] }
  0x32   : > { %v718_v12 = vsub.f32 %v3069_v7, %v4098_v43  ;;  %v2664_v56 = vpack.c.bf16 %v831_v19, %v824_v57  ;;  %v4106_v13 = vand.u32 4294901760, %v3086_v49  ;;  %v4107_v24 = vand.u32 4294901760, %v3088_v53 }
  0x33   : > { %4278 = vst [vmem:[#allocation22_spill] sm:$0xff] %v3158_v11  ;;  %4279 = vst [vmem:[#allocation23_spill] sm:$0xff] %v3160_v10  ;;  %2643 = vmatpush3.bf16.msra.mxu0 %v3158_v11  ;;  %v357_v4 = vand.u32 4294901760, %v296_v31  ;;  %v712_v58 = vand.u32 4294901760, %v711_v8  ;;  %v3179_v43 = vpack.c.bf16 %v408_v60, %v405_v5  ;;  %v3181_v54 = vsub.f32 %v312_v3, %v405_v5  ;;  %v186_v8 = vld [vmem:[%s3165_s30] sm:$0xff] }
  0x34   : > { %v719_v55 = vand.u32 4294901760, %v718_v12  ;;  %2665 = vmatprep.subr.bf16.mxu1 %v2664_v56  ;;  %v3184_v36 = vsub.f32 %v313_v25, %v408_v60  ;;  %v837_v19 = vsub.f32 %v3086_v49, %v4106_v13  ;;  %v844_v57 = vsub.f32 %v3088_v53, %v4107_v24  ;;  %v218_v12 = vld [vmem:[%s3165_s30 + $0x10] sm:$0xff] }
  0x35   : > { %4280 = vst [vmem:[#allocation24_spill] sm:$0xff] %v3179_v43  ;;  %4281 = vst [vmem:[#allocation25_spill] sm:$0xff] %v3181_v54  ;;  %v360_v44 = vand.u32 4294901760, %v297_v35  ;;  %2645 = vmatprep.subr.bf16.mxu0 %v3179_v43  ;;  %v3196_v3 = vsub.f32 %v296_v31, %v357_v4  ;;  %v4112_v25 = vand.u32 4294901760, %v3103_v59  ;;  %v4115_v5 = vand.u32 4294901760, %v3117_v34 }
  0x36   : > { %4282 = vst [vmem:[#allocation26_spill] sm:$0xff] %v3184_v36  ;;  %v2666_v11 = vpack.c.bf16 %v719_v55, %v712_v58  ;;  %v838_v60 = vand.u32 4294901760, %v837_v19  ;;  %v845_v56 = vand.u32 4294901760, %v844_v57  ;;  %v251_v31 = vadd.f32 %v219_v42, %v187_v37  ;;  %v221_v19 = vld [vmem:[%s3165_s30 + $0x38] sm:$0xff] }
  0x37   : > { %4283 = vst [vmem:[#allocation27_spill] sm:$0xff] %v3196_v3  ;;  %v3200_v13 = vpack.c.bf16 %v360_v44, %v357_v4  ;;  %v3202_v24 = vsub.f32 %v297_v35, %v360_v44  ;;  %v725_v55 = vsub.f32 %v3103_v59, %v4112_v25  ;;  %v732_v58 = vsub.f32 %v3117_v34, %v4115_v5  ;;  %v189_v35 = vld [vmem:[%s3165_s30 + $0x28] sm:$0xff] }
  0x38   : > { %2667 = vmatpush3.bf16.msra.mxu1 %v2666_v11  ;;  %v250_v43 = vadd.f32 %v218_v12, %v186_v8  ;;  %v2668_v1 = vpack.c.bf16 %v845_v56, %v838_v60  ;;  %v4116_v4 = vand.u32 4294901760, %v3133_v38  ;;  %v4119_v44 = vand.u32 4294901760, %v3136_v9  ;;  %v188_v60 = vld [vmem:[%s3165_s30 + $0x20] sm:$0xff]  ;;  %v220_v56 = vld [vmem:[%s3165_s30 + $0x30] sm:$0xff] }
  0x39   : > { %4284 = vst [vmem:[#allocation28_spill] sm:$0xff] %v3200_v13  ;;  %2647 = vmatpush3.bf16.msra.mxu0 %v3200_v13  ;;  %v4122_v11 = vand.u32 4294901760, %v3151_v2  ;;  %v726_v57 = vand.u32 4294901760, %v725_v55  ;;  %v733_v25 = vand.u32 4294901760, %v732_v58  ;;  %v3216_v30 = vand.u32 4294901760, %v251_v31 }
  0x3a   : > { %v3218_v5 = vand.u32 4294901760, %v250_v43  ;;  %2669 = vmatprep.subr.bf16.mxu1 %v2668_v1  ;;  %v851_v37 = vsub.f32 %v3133_v38, %v4116_v4  ;;  %v858_v42 = vsub.f32 %v3136_v9, %v4119_v44  ;;  %v4125_v12 = vand.u32 4294901760, %v3160_v10 }
  0x3b   : > { %4285 = vst [vmem:[#allocation29_spill] sm:$0xff] %v3216_v30  ;;  %v739_v8 = vsub.f32 %v3151_v2, %v4122_v11  ;;  %v2670_v55 = vpack.c.bf16 %v733_v25, %v726_v57  ;;  %v3233_v58 = vsub.f32 %v251_v31, %v3216_v30  ;;  %v253_v4 = vadd.f32 %v221_v19, %v189_v35 }
  0x3c   : > { %4286 = vst [vmem:[#allocation30_spill] sm:$0xff] %v3218_v5  ;;  %v3236_v1 = vsub.f32 %v250_v43, %v3218_v5  ;;  %876 = vmatprep.mubr.f32.mxu1 %v3216_v30  ;;  %v852_v13 = vand.u32 4294901760, %v851_v37  ;;  %v859_v44 = vand.u32 4294901760, %v858_v42  ;;  %v746_v11 = vsub.f32 %v3160_v10, %v4125_v12 }
  0x3d   : > { %4287 = vst [vmem:[#allocation31_spill] sm:$0xff] %v3233_v58  ;;  %v740_v9 = vand.u32 4294901760, %v739_v8  ;;  %2671 = vmatpush3.bf16.msra.mxu1 %v2670_v55  ;;  %v4127_v2 = vand.u32 4294901760, %v3233_v58  ;;  %v3244_v31 = vand.u32 4294901760, %v253_v4  ;;  %v252_v43 = vadd.f32 %v220_v56, %v188_v60  ;;  %v191_v56 = vld [vmem:[%s3165_s30 + $0x48] sm:$0xff] }
  0x3e   : > { %4288 = vst [vmem:[#allocation32_spill] sm:$0xff] %v3236_v1  ;;  %v4126_v25 = vand.u32 4294901760, %v3236_v1  ;;  %v2672_v35 = vpack.c.bf16 %v859_v44, %v852_v13  ;;  %v747_v19 = vand.u32 4294901760, %v746_v11  ;;  %v4128_v57 = vand.u32 4294901760, %v3181_v54 }
  0x3f   : > { %4289 = vst [vmem:[#allocation33_spill] sm:$0xff] %v3244_v31  ;;  %v4129_v37 = vand.u32 4294901760, %v3184_v36  ;;  %v413_v42 = vsub.f32 %v3233_v58, %v4127_v2  ;;  %v3255_v55 = vsub.f32 %v253_v4, %v3244_v31  ;;  %v3257_v12 = vand.u32 4294901760, %v252_v43  ;;  %v223_v4 = vld [vmem:[%s3165_s30 + $0x58] sm:$0xff] }
  0x40   : > { %v419_v8 = vsub.f32 %v3236_v1, %v4126_v25  ;;  %2673 = vmatprep.subr.bf16.mxu1 %v2672_v35  ;;  %v2674_v13 = vpack.c.bf16 %v747_v19, %v740_v9  ;;  %v865_v44 = vsub.f32 %v3181_v54, %v4128_v57  ;;  %v4136_v60 = vand.u32 4294901760, %v3196_v3  ;;  %v190_v1 = vld [vmem:[%s3165_s30 + $0x40] sm:$0xff]  ;;  %v225_v58 = vld [vmem:[%s3165_s30 + $0x78] sm:$0xff] }
  0x41   : > { %4290 = vst [vmem:[#allocation34_spill] sm:$0xff] %v3255_v55  ;;  %4291 = vst [vmem:[#allocation35_spill] sm:$0xff] %v3257_v12  ;;  %v872_v11 = vsub.f32 %v3184_v36, %v4129_v37  ;;  %v414_v25 = vand.u32 4294901760, %v413_v42  ;;  %v4143_v35 = vand.u32 4294901760, %v3255_v55  ;;  %v3270_v9 = vsub.f32 %v252_v43, %v3257_v12  ;;  %v222_v42 = vld [vmem:[%s3165_s30 + $0x50] sm:$0xff] }
  0x42   : > { %v420_v2 = vand.u32 4294901760, %v419_v8  ;;  %2675 = vmatpush3.bf16.msra.mxu1 %v2674_v13  ;;  %v866_v19 = vand.u32 4294901760, %v865_v44  ;;  %v753_v37 = vsub.f32 %v3196_v3, %v4136_v60  ;;  %v193_v8 = vld [vmem:[%s3165_s30 + $0x68] sm:$0xff]  ;;  %v2680_v44 = vpack.c.bf16 %v2951_v33, %v2949_v32  ;;  %v192_v60 = vld [vmem:[%s3165_s30 + $0x60] sm:$0xff]  ;;  %v224_v3 = vld [vmem:[%s3165_s30 + $0x70] sm:$0xff] }
  0x43   : > { %4292 = vst [vmem:[#allocation36_spill] sm:$0xff] %v3270_v9  ;;  %v873_v57 = vand.u32 4294901760, %v872_v11  ;;  %415 = vmatprep.mubr.f32.mxu0 %v414_v25  ;;  %v428_v43 = vsub.f32 %v3255_v55, %v4143_v35  ;;  %v255_v11 = vadd.f32 %v223_v4, %v191_v56  ;;  %v4293_v54 = vand.u32 4294901760, %v3202_v24  ;;  %v195_v13 = vld [vmem:[%s3165_s30 + $0x88] sm:$0xff]  ;;  %v227_v55 = vld [vmem:[%s3165_s30 + $0x98] sm:$0xff] }
  0x44   : > { %421 = vmatmul.mubr.f32.vlgmr.msra.gmra.mrb[0].mxu0 %v420_v2  ;;  %v754_v36 = vand.u32 4294901760, %v753_v37  ;;  %v2682_v35 = vpack.c.bf16 %v2927_v21, %v2917_v15  ;;  %v4294_v56 = vand.u32 4294901760, %v3270_v9  ;;  %2681 = vmatprep.subr.bf16.mxu0 %v2680_v44  ;;  %v2684_v21 = vpack.c.bf16 %v2940_v26, %v2931_v23  ;;  %v194_v15 = vld [vmem:[%s3165_s30 + $0x80] sm:$0xff] }
  0x45   : > { %v2676_v30 = vpack.c.bf16 %v873_v57, %v866_v19  ;;  %v760_v25 = vsub.f32 %v3202_v24, %v4293_v54  ;;  %v429_v10 = vand.u32 4294901760, %v428_v43  ;;  %v3298_v2 = vand.u32 4294901760, %v255_v11  ;;  %v226_v43 = vld [vmem:[%s3165_s30 + $0x90] sm:$0xff] }
  0x46   : > { %v434_v4 = vsub.f32 %v3270_v9, %v4294_v56  ;;  %v254_v57 = vadd.f32 %v222_v42, %v190_v1  ;;  %2683 = vmatpush3.bf16.msra.mxu0 %v2682_v35  ;;  %v257_v54 = vadd.f32 %v225_v58, %v193_v8  ;;  %v256_v19 = vadd.f32 %v224_v3, %v192_v60  ;;  %v229_v42 = vld [vmem:[%s3165_s30 + $0xb8] sm:$0xff] }
  0x47   : > { %4295 = vst [vmem:[#allocation37_spill] sm:$0xff] %v3298_v2  ;;  %2677 = vmatprep.subr.bf16.mxu1 %v2676_v30  ;;  %v761_v37 = vand.u32 4294901760, %v760_v25  ;;  %430 = vmatprep.mubr.f32.mxu0 %v429_v10  ;;  %v3305_v44 = vsub.f32 %v255_v11, %v3298_v2  ;;  %v259_v1 = vadd.f32 %v227_v55, %v195_v13  ;;  %v197_v30 = vld [vmem:[%s3165_s30 + $0xa8] sm:$0xff]  ;;  %v196_v13 = vld [vmem:[%s3165_s30 + $0xa0] sm:$0xff]  ;;  %v228_v25 = vld [vmem:[%s3165_s30 + $0xb0] sm:$0xff] }
  0x48   : > { %v435_v33 = vand.u32 4294901760, %v434_v4  ;;  %v3307_v56 = vand.u32 4294901760, %v254_v57  ;;  %v3311_v58 = vand.u32 4294901760, %v257_v54  ;;  %v3313_v3 = vand.u32 4294901760, %v256_v19  ;;  %2685 = vmatprep.subr.bf16.mxu0 %v2684_v21 }
  0x49   : > { %4296 = vst [vmem:[#allocation38_spill] sm:$0xff] %v3305_v44  ;;  %v2678_v35 = vpack.c.bf16 %v761_v37, %v754_v36  ;;  %v2686_v10 = vpack.c.bf16 %v2946_v29, %v2944_v28  ;;  %v4152_v60 = vand.u32 4294901760, %v3305_v44  ;;  %v3321_v11 = vand.u32 4294901760, %v259_v1 }
  0x4a   : > { %4297 = vst [vmem:[#allocation39_spill] sm:$0xff] %v3307_v56  ;;  %4298 = vst [vmem:[#allocation40_spill] sm:$0xff] %v3311_v58  ;;  %436 = vmatmul.mubr.f32.gmra.mrb[2].mxu0 %v435_v33  ;;  %v3319_v8 = vsub.f32 %v254_v57, %v3307_v56  ;;  %v258_v55 = vadd.f32 %v226_v43, %v194_v15  ;;  %v3326_v36 = vsub.f32 %v257_v54, %v3311_v58 }
  0x4b   : > { %4299 = vst [vmem:[#allocation41_spill] sm:$0xff] %v3313_v3  ;;  %4301 = vst [vmem:[#allocation43_spill] sm:$0xff] %v3321_v11  ;;  %2679 = vmatpush3.bf16.msra.mxu1 %v2678_v35  ;;  %v3329_v21 = vsub.f32 %v256_v19, %v3313_v3  ;;  %2687 = vmatpush3.bf16.msra.mxu0 %v2686_v10  ;;  %v261_v4 = vadd.f32 %v229_v42, %v197_v30 }
  0x4c   : > { %4300 = vst [vmem:[#allocation42_spill] sm:$0xff] %v3319_v8  ;;  %4302 = vst [vmem:[#allocation44_spill] sm:$0xff] %v3326_v36  ;;  %v443_v33 = vsub.f32 %v3305_v44, %v4152_v60  ;;  %v4151_v57 = vand.u32 4294901760, %v3319_v8  ;;  %2713 = vmatprep.subr.bf16.mxu1 %v2915_v14  ;;  %v3337_v15 = vsub.f32 %v259_v1, %v3321_v11  ;;  %v3339_v37 = vand.u32 4294901760, %v258_v55  ;;  %v231_v60 = vld [vmem:[%s3165_s30 + $0xd8] sm:$0xff]  ;;  %v198_v1 = vld [vmem:[%s3165_s30 + $0xc0] sm:$0xff] }
  0x4d   : > { %4303 = vst [vmem:[#allocation45_spill] sm:$0xff] %v3329_v21  ;;  %v4155_v54 = vand.u32 4294901760, %v3326_v36  ;;  %v4160_v19 = vand.u32 4294901760, %v3329_v21  ;;  %v3343_v43 = vand.u32 4294901760, %v261_v4  ;;  %v260_v30 = vadd.f32 %v228_v25, %v196_v13 }
  0x4e   : > { %4304 = vst [vmem:[#allocation46_spill] sm:$0xff] %v3337_v15  ;;  %4305 = vst [vmem:[#allocation47_spill] sm:$0xff] %v3339_v37  ;;  %v444_v42 = vand.u32 4294901760, %v443_v33  ;;  %v449_v35 = vsub.f32 %v3319_v8, %v4151_v57  ;;  %878 = vmatmul.mubr.f32.vlgmr.msra.gmra.mrb[0].mxu1 %v3218_v5  ;;  %v3351_v10 = vsub.f32 %v258_v55, %v3339_v37  ;;  %v199_v57 = vld [vmem:[%s3165_s30 + $0xc8] sm:$0xff]  ;;  %v233_v8 = vld [vmem:[%s3165_s30 + $0xf8] sm:$0xff] }
  0x4f   : > { %4306 = vst [vmem:[#allocation48_spill] sm:$0xff] %v3343_v43  ;;  %2715 = vmatpush3.bf16.msra.mxu1 %v2925_v20  ;;  %v458_v13 = vsub.f32 %v3326_v36, %v4155_v54  ;;  %883 = vmatprep.mubr.f32.mxu1 %v3244_v31  ;;  %v464_v25 = vsub.f32 %v3329_v21, %v4160_v19  ;;  %v3364_v55 = vand.u32 4294901760, %v260_v30  ;;  %v4310_v54 = vand.u32 4294901760, %v3337_v15  ;;  %v230_v19 = vld [vmem:[%s3165_s30 + $0xd0] sm:$0xff]  ;;  %v201_v21 = vld [vmem:[%s3165_s30 + $0xe8] sm:$0xff] }
  0x50   : > { %4307 = vst [vmem:[#allocation49_spill] sm:$0xff] %v3351_v10  ;;  %v3362_v33 = vsub.f32 %v261_v4, %v3343_v43  ;;  %445 = vmatprep.mubr.f32.mxu0 %v444_v42  ;;  %v450_v5 = vand.u32 4294901760, %v449_v35  ;;  %2717 = vmatprep.subr.bf16.mxu1 %v2929_v22  ;;  %v2688_v4 = vpack.c.bf16 %v2963_v41, %v2961_v40  ;;  %v232_v35 = vld [vmem:[%s3165_s30 + $0xf0] sm:$0xff] }
  0x51   : > { %4309 = vst [vmem:[#allocation51_spill] sm:$0xff] %v3364_v55  ;;  %v473_v31 = vsub.f32 %v3337_v15, %v4310_v54  ;;  %v459_v20 = vand.u32 4294901760, %v458_v13  ;;  %v465_v44 = vand.u32 4294901760, %v464_v25  ;;  %v3381_v42 = vsub.f32 %v260_v30, %v3364_v55  ;;  %v200_v54 = vld [vmem:[%s3165_s30 + $0xe0] sm:$0xff] }
  0x52   : > { %4308 = vst [vmem:[#allocation50_spill] sm:$0xff] %v3362_v33  ;;  %v4180_v9 = vand.u32 4294901760, %v3362_v33  ;;  %451 = vmatmul.mubr.f32.gmra.mrb[4].mxu0 %v450_v5  ;;  %885 = vmatmul.mubr.f32.gmra.mrb[2].mxu1 %v3257_v12  ;;  %v4312_v15 = vand.u32 4294901760, %v3351_v10  ;;  %v263_v41 = vadd.f32 %v231_v60, %v199_v57  ;;  %v2690_v13 = vpack.c.bf16 %v2974_v47, %v2972_v46  ;;  %v203_v12 = vld [vmem:[%s3165_s30 + $0x108] sm:$0xff] }
  0x53   : > { %4311 = vst [vmem:[#allocation52_spill] sm:$0xff] %v3381_v42  ;;  %v474_v36 = vand.u32 4294901760, %v473_v31  ;;  %460 = vmatprep.mubr.f32.mxu0 %v459_v20  ;;  %890 = vmatprep.mubr.f32.mxu1 %v3298_v2  ;;  %v4181_v30 = vand.u32 4294901760, %v3381_v42  ;;  %v262_v31 = vadd.f32 %v230_v19, %v198_v1  ;;  %v265_v25 = vadd.f32 %v233_v8, %v201_v21  ;;  %v205_v1 = vld [vmem:[%s3165_s30 + $0x128] sm:$0xff] }
  0x54   : > { %v479_v22 = vsub.f32 %v3351_v10, %v4312_v15  ;;  %v488_v5 = vsub.f32 %v3362_v33, %v4180_v9  ;;  %v235_v15 = vld [vmem:[%s3165_s30 + $0x118] sm:$0xff]  ;;  %2719 = vmatpush3.bf16.msra.mxu1 %v2942_v27  ;;  %2689 = vmatprep.subr.bf16.mxu0 %v2688_v4  ;;  %v3399_v57 = vand.u32 4294901760, %v263_v41  ;;  %v264_v20 = vadd.f32 %v232_v35, %v200_v54  ;;  %v202_v10 = vld [vmem:[%s3165_s30 + $0x100] sm:$0xff]  ;;  %v234_v9 = vld [vmem:[%s3165_s30 + $0x110] sm:$0xff] }
  0x55   : > { %v2692_v2 = vpack.c.bf16 %v3002_v0, %v2998_v61  ;;  %v494_v8 = vsub.f32 %v3381_v42, %v4181_v30  ;;  %2691 = vmatpush3.bf16.msra.mxu0 %v2690_v13  ;;  %2721 = vmatprep.subr.bf16.mxu1 %v2959_v39  ;;  %v3411_v21 = vand.u32 4294901760, %v265_v25  ;;  %v237_v4 = vld [vmem:[%s3165_s30 + $0x138] sm:$0xff]  ;;  %v2694_v13 = vpack.c.bf16 %v3027_v18, %v3025_v17  ;;  %v204_v30 = vld [vmem:[%s3165_s30 + $0x120] sm:$0xff]  ;;  %v236_v42 = vld [vmem:[%s3165_s30 + $0x130] sm:$0xff] }
  0x56   : > { %v480_v60 = vand.u32 4294901760, %v479_v22  ;;  %4313 = vst [vmem:[#allocation53_spill] sm:$0xff] %v3399_v57  ;;  %v489_v19 = vand.u32 4294901760, %v488_v5  ;;  %v3408_v22 = vand.u32 4294901760, %v262_v31  ;;  %466 = vmatmul.mubr.f32.gmra.mrb[6].mxu0 %v465_v44  ;;  %892 = vmatmul.mubr.f32.gmra.mrb[4].mxu1 %v3307_v56  ;;  %v3417_v54 = vsub.f32 %v263_v41, %v3399_v57 }
  0x57   : > { %4315 = vst [vmem:[#allocation55_spill] sm:$0xff] %v3411_v21  ;;  %v3419_v35 = vand.u32 4294901760, %v264_v20  ;;  %v267_v5 = vadd.f32 %v235_v15, %v203_v12  ;;  %475 = vmatprep.mubr.f32.mxu0 %v474_v36  ;;  %897 = vmatprep.mubr.f32.mxu1 %v3311_v58  ;;  %v495_v33 = vand.u32 4294901760, %v494_v8  ;;  %v3430_v44 = vsub.f32 %v265_v25, %v3411_v21 }
  0x58   : > { %4314 = vst [vmem:[#allocation54_spill] sm:$0xff] %v3408_v22  ;;  %4316 = vst [vmem:[#allocation56_spill] sm:$0xff] %v3417_v54  ;;  %v3427_v39 = vsub.f32 %v262_v31, %v3408_v22  ;;  %v266_v41 = vadd.f32 %v234_v9, %v202_v10  ;;  %v4193_v56 = vand.u32 4294901760, %v3417_v54  ;;  %2723 = vmatpush3.bf16.msra.mxu1 %v2970_v45  ;;  %2693 = vmatprep.subr.bf16.mxu0 %v2692_v2 }
  0x59   : > { %4317 = vst [vmem:[#allocation57_spill] sm:$0xff] %v3419_v35  ;;  %4319 = vst [vmem:[#allocation59_spill] sm:$0xff] %v3430_v44  ;;  %v3435_v12 = vsub.f32 %v264_v20, %v3419_v35  ;;  %v3437_v15 = vand.u32 4294901760, %v267_v5  ;;  %v269_v36 = vadd.f32 %v237_v4, %v205_v1  ;;  %v4191_v31 = vand.u32 4294901760, %v3430_v44  ;;  %2695 = vmatpush3.bf16.msra.mxu0 %v2694_v13 }
  0x5a   : > { %4318 = vst [vmem:[#allocation58_spill] sm:$0xff] %v3427_v39  ;;  %v4192_v8 = vand.u32 4294901760, %v3427_v39  ;;  %v3441_v58 = vand.u32 4294901760, %v266_v41  ;;  %2725 = vmatprep.subr.bf16.mxu1 %v3000_v63  ;;  %v268_v9 = vadd.f32 %v236_v42, %v204_v30  ;;  %481 = vmatmul.mubr.f32.gmra.mrb[8].mxu0 %v480_v60  ;;  %v503_v2 = vsub.f32 %v3417_v54, %v4193_v56 }
  0x5b   : > { %4320 = vst [vmem:[#allocation60_spill] sm:$0xff] %v3435_v12  ;;  %4321 = vst [vmem:[#allocation61_spill] sm:$0xff] %v3437_v15  ;;  %899 = vmatmul.mubr.f32.gmra.mrb[6].mxu1 %v3313_v3  ;;  %v4196_v10 = vand.u32 4294901760, %v3435_v12  ;;  %v3450_v25 = vsub.f32 %v267_v5, %v3437_v15  ;;  %v3452_v20 = vand.u32 4294901760, %v269_v36  ;;  %490 = vmatprep.mubr.f32.mxu0 %v489_v19  ;;  %v209_v5 = vld [vmem:[%s3165_s30 + $0x168] sm:$0xff]  ;;  %v241_v3 = vld [vmem:[%s3165_s30 + $0x178] sm:$0xff] }
  0x5c   : > { %4322 = vst [vmem:[#allocation62_spill] sm:$0xff] %v3441_v58  ;;  %904 = vmatprep.mubr.f32.mxu1 %v3321_v11  ;;  %v509_v42 = vsub.f32 %v3427_v39, %v4192_v8  ;;  %v518_v30 = vsub.f32 %v3430_v44, %v4191_v31  ;;  %v3462_v60 = vsub.f32 %v266_v41, %v3441_v58  ;;  %v3464_v1 = vand.u32 4294901760, %v268_v9  ;;  %v207_v31 = vld [vmem:[%s3165_s30 + $0x148] sm:$0xff]  ;;  %v239_v41 = vld [vmem:[%s3165_s30 + $0x158] sm:$0xff]  ;;  %v206_v8 = vld [vmem:[%s3165_s30 + $0x140] sm:$0xff] }
  0x5d   : > { %4323 = vst [vmem:[#allocation63_spill] sm:$0xff] %v3450_v25  ;;  %4324 = vst [vmem:[#allocation64_spill] sm:$0xff] %v3452_v20  ;;  %v504_v4 = vand.u32 4294901760, %v503_v2  ;;  %v3469_v19 = vsub.f32 %v3435_v12, %v4196_v10  ;;  %2727 = vmatpush3.bf16.msra.mxu1 %v3023_v16  ;;  %v3474_v13 = vsub.f32 %v269_v36, %v3452_v20  ;;  %v238_v10 = vld [vmem:[%s3165_s30 + $0x150] sm:$0xff]  ;;  %v4328_v12 = vand.u32 4294901760, %v3450_v25  ;;  %v208_v2 = vld [vmem:[%s3165_s30 + $0x160] sm:$0xff] }
  0x5e   : > { %4325 = vst [vmem:[#allocation65_spill] sm:$0xff] %v3462_v60  ;;  %v510_v56 = vand.u32 4294901760, %v509_v42  ;;  %v3481_v11 = vsub.f32 %v268_v9, %v3464_v1  ;;  %2729 = vmatprep.subr.bf16.mxu1 %v3041_v50  ;;  %496 = vmatmul.mubr.f32.gmra.mrb[10].mxu0 %v495_v33  ;;  %v519_v36 = vand.u32 4294901760, %v518_v30  ;;  %v2696_v9 = vpack.c.bf16 %v3045_v52, %v3043_v51  ;;  %v240_v39 = vld [vmem:[%s3165_s30 + $0x170] sm:$0xff]  ;;  %v243_v50 = vld [vmem:[%s3165_s30 + $0x198] sm:$0xff] }
  0x5f   : > { %4326 = vst [vmem:[#allocation66_spill] sm:$0xff] %v3474_v13  ;;  %906 = vmatmul.mubr.f32.gmra.mrb[8].mxu1 %v3339_v37  ;;  %v533_v44 = vsub.f32 %v3450_v25, %v4328_v12  ;;  %505 = vmatprep.mubr.f32.mxu0 %v504_v4  ;;  %v4329_v33 = vand.u32 4294901760, %v3462_v60  ;;  %v271_v37 = vadd.f32 %v239_v41, %v207_v31  ;;  %v525_v25 = vand.u32 4294901760, %v3469_v19  ;;  %v210_v19 = vld [vmem:[%s3165_s30 + $0x180] sm:$0xff] }
  0x60   : > { %4327 = vst [vmem:[#allocation67_spill] sm:$0xff] %v3481_v11  ;;  %911 = vmatprep.mubr.f32.mxu1 %v3343_v43  ;;  %v2698_v42 = vpack.c.bf16 %v3069_v7, %v3060_v62  ;;  %2697 = vmatprep.subr.bf16.mxu0 %v2696_v9  ;;  %v270_v54 = vadd.f32 %v238_v10, %v206_v8  ;;  %v211_v43 = vld [vmem:[%s3165_s30 + $0x188] sm:$0xff]  ;;  %v242_v9 = vld [vmem:[%s3165_s30 + $0x190] sm:$0xff] }
  0x61   : > { %v3500_v30 = vsub.f32 %v3462_v60, %v4329_v33  ;;  %2731 = vmatpush3.bf16.msra.mxu1 %v3067_v6  ;;  %v273_v4 = vadd.f32 %v241_v3, %v209_v5  ;;  %v534_v33 = vand.u32 4294901760, %v533_v44  ;;  %v4330_v60 = vand.u32 4294901760, %v3474_v13  ;;  %v4346_v62 = vld [vmem:[#allocation28_spill] sm:$0xff] }
  0x62   : > { %v3514_v31 = vand.u32 4294901760, %v271_v37  ;;  %2699 = vmatpush3.bf16.msra.mxu0 %v2698_v42  ;;  %v272_v41 = vadd.f32 %v240_v39, %v208_v2  ;;  %2733 = vmatprep.subr.bf16.mxu1 %v3084_v48  ;;  %v3521_v44 = vand.u32 4294901760, %v270_v54  ;;  %v2700_v10 = vpack.c.bf16 %v3088_v53, %v3086_v49  ;;  %v245_v39 = vld [vmem:[%s3165_s30 + $0x1b8] sm:$0xff]  ;;  %v4344_v49 = vld [vmem:[#allocation23_spill] sm:$0xff] }
  0x63   : > { %v3512_v12 = vsub.f32 %v3474_v13, %v4330_v60  ;;  %511 = vmatmul.mubr.f32.gmra.mrb[12].mxu0 %v510_v56  ;;  %913 = vmatmul.mubr.f32.gmra.mrb[10].mxu1 %v3364_v55  ;;  %v540_v3 = vand.u32 4294901760, %v3500_v30  ;;  %v3523_v8 = vand.u32 4294901760, %v273_v4  ;;  %v213_v60 = vld [vmem:[%s3165_s30 + $0x1a8] sm:$0xff]  ;;  %v4331_v5 = vand.u32 4294901760, %v3481_v11  ;;  %v212_v55 = vld [vmem:[%s3165_s30 + $0x1a0] sm:$0xff]  ;;  %v244_v13 = vld [vmem:[%s3165_s30 + $0x1b0] sm:$0xff] }
  0x64   : > { %520 = vmatprep.mubr.f32.mxu0 %v519_v36  ;;  %918 = vmatprep.mubr.f32.mxu1 %v3399_v57  ;;  %v3536_v2 = vsub.f32 %v271_v37, %v3514_v31  ;;  %v3538_v42 = vand.u32 4294901760, %v272_v41  ;;  %v275_v30 = vadd.f32 %v243_v50, %v211_v43  ;;  %v3543_v48 = vsub.f32 %v270_v54, %v3521_v44  ;;  %v4336_v50 = vld [vmem:[#allocation18_spill] sm:$0xff]  ;;  %v4343_v53 = vld [vmem:[#allocation21_spill] sm:$0xff] }
  0x65   : > { %v3533_v56 = vsub.f32 %v3481_v11, %v4331_v5  ;;  %v3546_v36 = vsub.f32 %v273_v4, %v3523_v8  ;;  %2701 = vmatprep.subr.bf16.mxu0 %v2700_v10  ;;  %v2702_v57 = vpack.c.bf16 %v3117_v34, %v3103_v59  ;;  %v274_v5 = vadd.f32 %v242_v9, %v210_v19  ;;  %v214_v4 = vld [vmem:[%s3165_s30 + $0x1c0] sm:$0xff] }
  0x66   : > { %4332 = vst [vmem:[#allocation68_spill] sm:$0xff] %v3536_v2  ;;  %4333 = vst [vmem:[#allocation69_spill] sm:$0xff] %v3543_v48  ;;  %v4226_v11 = vand.u32 4294901760, %v3536_v2  ;;  %v3552_v37 = vsub.f32 %v272_v41, %v3538_v42  ;;  %v3554_v6 = vand.u32 4294901760, %v275_v30  ;;  %2735 = vmatpush3.bf16.msra.mxu1 %v4336_v50  ;;  %v277_v43 = vadd.f32 %v245_v39, %v213_v60  ;;  %v248_v50 = vld [vmem:[%s3165_s30 + $0x1f0] sm:$0xff] }
  0x67   : > { %4334 = vst [vmem:[#allocation70_spill] sm:$0xff] %v3546_v36  ;;  %526 = vmatmul.mubr.f32.gmra.mrb[14].mxu0 %v525_v25  ;;  %920 = vmatmul.mubr.f32.gmra.mrb[12].mxu1 %v3408_v22  ;;  %v4229_v54 = vand.u32 4294901760, %v3543_v48  ;;  %v3560_v19 = vand.u32 4294901760, %v274_v5  ;;  %v276_v9 = vadd.f32 %v244_v13, %v212_v55  ;;  %v549_v41 = vand.u32 4294901760, %v3512_v12  ;;  %v4338_v13 = vld [vmem:[#allocation19_spill] sm:$0xff]  ;;  %v246_v22 = vld [vmem:[%s3165_s30 + $0x1d0] sm:$0xff] }
  0x68   : > { %4335 = vst [vmem:[#allocation71_spill] sm:$0xff] %v3552_v37  ;;  %535 = vmatprep.mubr.f32.mxu0 %v534_v33  ;;  %925 = vmatprep.mubr.f32.mxu1 %v3411_v21  ;;  %v563_v25 = vsub.f32 %v3536_v2, %v4226_v11  ;;  %v3568_v10 = vsub.f32 %v275_v30, %v3554_v6  ;;  %v3570_v60 = vand.u32 4294901760, %v277_v43  ;;  %v215_v30 = vld [vmem:[%s3165_s30 + $0x1c8] sm:$0xff]  ;;  %v247_v11 = vld [vmem:[%s3165_s30 + $0x1d8] sm:$0xff]  ;;  %v4339_v21 = vld [vmem:[#allocation22_spill] sm:$0xff] }
  0x69   : > { %v569_v39 = vsub.f32 %v3543_v48, %v4229_v54  ;;  %2703 = vmatpush3.bf16.msra.mxu0 %v2702_v57  ;;  %2737 = vmatprep.subr.bf16.mxu1 %v4338_v13  ;;  %v3578_v12 = vsub.f32 %v274_v5, %v3560_v19  ;;  %v3580_v33 = vand.u32 4294901760, %v276_v9  ;;  %v555_v54 = vand.u32 4294901760, %v3533_v56  ;;  %v217_v48 = vld [vmem:[%s3165_s30 + $0x1e8] sm:$0xff]  ;;  %v249_v2 = vld [vmem:[%s3165_s30 + $0x1f8] sm:$0xff]  ;;  %v4341_v56 = vld [vmem:[#allocation20_spill] sm:$0xff] }
  0x6a   : > { %4337 = vst [vmem:[#allocation72_spill] sm:$0xff] %v3568_v10  ;;  %2739 = vmatpush3.bf16.msra.mxu1 %v4339_v21  ;;  %v4340_v57 = vand.u32 4294901760, %v3546_v36  ;;  %v3592_v5 = vsub.f32 %v277_v43, %v3570_v60  ;;  %v564_v13 = vand.u32 4294901760, %v563_v25  ;;  %v2704_v21 = vpack.c.bf16 %v4341_v56, %v3133_v38 }
  0x6b   : > { %541 = vmatmul.mubr.f32.gmra.mrb[16].mxu0 %v540_v3  ;;  %927 = vmatmul.mubr.f32.gmra.mrb[14].mxu1 %v3419_v35  ;;  %v216_v35 = vld [vmem:[%s3165_s30 + $0x1e0] sm:$0xff]  ;;  %v570_v16 = vand.u32 4294901760, %v569_v39  ;;  %v2706_v63 = vpack.c.bf16 %v4344_v49, %v4343_v53  ;;  %v4256_v25 = vand.u32 4294901760, %v3578_v12  ;;  %v3611_v3 = vsub.f32 %v276_v9, %v3580_v33 }
  0x6c   : > { %v578_v55 = vsub.f32 %v3546_v36, %v4340_v57  ;;  %550 = vmatprep.mubr.f32.mxu0 %v549_v41  ;;  %932 = vmatprep.mubr.f32.mxu1 %v3437_v15  ;;  %v4342_v57 = vand.u32 4294901760, %v3552_v37  ;;  %v279_v36 = vadd.f32 %v247_v11, %v215_v30  ;;  %v4345_v41 = vld [vmem:[#allocation24_spill] sm:$0xff]  ;;  %v278_v15 = vadd.f32 %v246_v22, %v214_v4  ;;  %v4350_v11 = vld [vmem:[#allocation27_spill] sm:$0xff] }
  0x6d   : > { %2741 = vmatprep.subr.bf16.mxu1 %v4345_v41  ;;  %2705 = vmatprep.subr.bf16.mxu0 %v2704_v21  ;;  %v281_v7 = vadd.f32 %v249_v2, %v217_v48  ;;  %v4347_v9 = vand.u32 4294901760, %v3568_v10  ;;  %v4348_v2 = vld [vmem:[#allocation25_spill] sm:$0xff] }
  0x6e   : > { %v584_v43 = vsub.f32 %v3552_v37, %v4342_v57  ;;  %2743 = vmatpush3.bf16.msra.mxu1 %v4346_v62  ;;  %v579_v39 = vand.u32 4294901760, %v578_v55  ;;  %v3616_v30 = vand.u32 4294901760, %v279_v36  ;;  %v280_v57 = vadd.f32 %v248_v50, %v216_v35  ;;  %2707 = vmatpush3.bf16.msra.mxu0 %v2706_v63 }
  0x6f   : > { %556 = vmatmul.mubr.f32.gmra.mrb[18].mxu0 %v555_v54  ;;  %934 = vmatmul.mubr.f32.gmra.mrb[16].mxu1 %v3441_v58  ;;  %v593_v21 = vsub.f32 %v3568_v10, %v4347_v9  ;;  %v3622_v22 = vand.u32 4294901760, %v278_v15  ;;  %v3624_v48 = vand.u32 4294901760, %v281_v7  ;;  %v4349_v54 = vld [vmem:[#allocation26_spill] sm:$0xff]  ;;  %v2710_v35 = vpack.c.bf16 %v3202_v24, %v4350_v11 }
  0x70   : > { %565 = vmatprep.mubr.f32.mxu0 %v564_v13  ;;  %939 = vmatprep.mubr.f32.mxu1 %v3452_v20  ;;  %v2708_v4 = vpack.c.bf16 %v4349_v54, %v4348_v2  ;;  %v3629_v55 = vsub.f32 %v279_v36, %v3616_v30  ;;  %v599_v50 = vsub.f32 %v3578_v12, %v4256_v25  ;;  %v613_v13 = vand.u32 4294901760, %v3611_v3  ;;  %v4352_v20 = vld [vmem:[#allocation6_spill] sm:$0xff] }
  0x71   : > { %2777 = vmatprep.subr.bf16.mxu1 %v2915_v14  ;;  %v4351_v9 = vand.u32 4294901760, %v2949_v32  ;;  %v4353_v58 = vand.u32 4294901760, %v4352_v20  ;;  %v585_v36 = vand.u32 4294901760, %v584_v43  ;;  %v4354_v63 = vand.u32 4294901760, %v3592_v5 }
  0x72   : > { %2709 = vmatprep.subr.bf16.mxu0 %v2708_v4  ;;  %v3647_v37 = vsub.f32 %v278_v15, %v3622_v22  ;;  %v3649_v25 = vand.u32 4294901760, %v280_v57  ;;  %v594_v4 = vand.u32 4294901760, %v593_v21  ;;  %v4257_v32 = vand.u32 4294901760, %v3629_v55 }
  0x73   : > { %v2744_v10 = vpack.c.bf16 %v4353_v58, %v4351_v9  ;;  %571 = vmatmul.mubr.f32.gmra.mrb[20].mxu0 %v570_v16  ;;  %941 = vmatmul.mubr.f32.gmra.mrb[18].mxu1 %v3464_v1  ;;  %v608_v14 = vsub.f32 %v3592_v5, %v4354_v63  ;;  %v3654_v16 = vsub.f32 %v281_v7, %v3624_v48  ;;  %v600_v58 = vand.u32 4294901760, %v599_v50 }
  0x74   : > { %580 = vmatprep.mubr.f32.mxu0 %v579_v39  ;;  %946 = vmatprep.mubr.f32.mxu1 %v3514_v31  ;;  %v614_v20 = vsub.f32 %v3611_v3, %v613_v13  ;;  %v628_v43 = vand.u32 4294901760, %v3647_v37  ;;  %v3662_v39 = vsub.f32 %v280_v57, %v3649_v25  ;;  %v4355_v21 = vand.u32 4294901760, %v3103_v59 }
  0x75   : > { %2711 = vmatpush3.bf16.msra.mxu0 %v2710_v35  ;;  %v609_v15 = vand.u32 4294901760, %v608_v14  ;;  %v4356_v7 = vand.u32 4294901760, %v3117_v34  ;;  %v637_v50 = vand.u32 4294901760, %v3654_v16  ;;  %v4357_v9 = vand.u32 4294901760, %v3133_v38 }
  0x76   : > { %2745 = vmatprep.subr.bf16.mxu0 %v2744_v10  ;;  %v623_v10 = vsub.f32 %v3629_v55, %v4257_v32  ;;  %v4358_v57 = vand.u32 4294901760, %v4341_v56  ;;  %v4359_v59 = vand.u32 4294901760, %v4343_v53  ;;  %v4360_v34 = vand.u32 4294901760, %v4344_v49 }
  0x77   : > { %586 = vmatmul.mubr.f32.gmra.mrb[22].mxu0 %v585_v36  ;;  %948 = vmatmul.mubr.f32.gmra.mrb[20].mxu1 %v3521_v44  ;;  %v3668_v35 = vpack.c.bf16 %v4356_v7, %v4355_v21  ;;  %v4361_v14 = vand.u32 4294901760, %v4348_v2  ;;  %v4363_v7 = vand.u32 4294901760, %v4350_v11  ;;  %v4364_v38 = vand.u32 4294901760, %v3202_v24 }
  0x78   : > { %595 = vmatprep.mubr.f32.mxu0 %v594_v4  ;;  %953 = vmatprep.mubr.f32.mxu1 %v3523_v8  ;;  %v3679_v36 = vpack.c.bf16 %v4358_v57, %v4357_v9  ;;  %v3685_v63 = vpack.c.bf16 %v4360_v34, %v4359_v59  ;;  %v4362_v4 = vand.u32 4294901760, %v4349_v54  ;;  %v615_v56 = vand.u32 4294901760, %v614_v20  ;;  %v4368_v57 = vld [vmem:[#allocation4_spill] sm:$0xff] }
  0x79   : > { %v3697_v32 = vpack.c.bf16 %v4364_v38, %v4363_v7  ;;  %v629_v49 = vsub.f32 %v3647_v37, %v628_v43  ;;  %v643_v53 = vand.u32 4294901760, %v3662_v39  ;;  %v624_v2 = vand.u32 4294901760, %v623_v10  ;;  %v4366_v10 = vld [vmem:[#allocation2_spill] sm:$0xff]  ;;  %v4372_v38 = vld [vmem:[#allocation32_spill] sm:$0xff] }
  0x7a   : > { %v3691_v21 = vpack.c.bf16 %v4362_v4, %v4361_v14  ;;  %v638_v24 = vsub.f32 %v3654_v16, %v637_v50  ;;  %v4367_v9 = vand.u32 4294901760, %v4366_v10  ;;  %v4369_v59 = vand.u32 4294901760, %v4368_v57 }
  0x7b   : > { %601 = vmatmul.mubr.f32.gmra.mrb[24].mxu0 %v600_v58  ;;  %955 = vmatmul.mubr.f32.gmra.mrb[22].mxu1 %v3538_v42  ;;  %v630_v11 = vand.u32 4294901760, %v629_v49  ;;  %v644_v54 = vsub.f32 %v3662_v39, %v643_v53  ;;  %v4370_v14 = vand.u32 4294901760, %v2931_v23  ;;  %v4371_v4 = vand.u32 4294901760, %v2940_v26  ;;  %v4378_v26 = vld [vmem:[#allocation8_spill] sm:$0xff] }
  0x7c   : > { %610 = vmatprep.mubr.f32.mxu0 %v609_v15  ;;  %960 = vmatprep.mubr.f32.mxu1 %v3554_v6  ;;  %v639_v58 = vand.u32 4294901760, %v638_v24  ;;  %v4365_v15 = vld [vmem:[#allocation31_spill] sm:$0xff]  ;;  %v2746_v34 = vpack.c.bf16 %v4369_v59, %v4367_v9  ;;  %v4376_v24 = vand.u32 4294901760, %v2946_v29  ;;  %v4377_v23 = vand.u32 4294901760, %v2961_v40  ;;  %v4382_v9 = vld [vmem:[#allocation38_spill] sm:$0xff]  ;;  %v4387_v59 = vld [vmem:[#allocation5_spill] sm:$0xff] }
  0x7d   : > { %v645_v20 = vand.u32 4294901760, %v644_v54  ;;  %v2748_v7 = vpack.c.bf16 %v4371_v4, %v4370_v14  ;;  %v4374_v49 = vand.u32 4294901760, %v4365_v15  ;;  %v4379_v54 = vand.u32 4294901760, %v4378_v26 }
  0x7e   : > { %v4381_v10 = vand.u32 4294901760, %v4372_v38  ;;  %v4385_v29 = vand.u32 4294901760, %v2972_v46  ;;  %v4386_v40 = vand.u32 4294901760, %v2974_v47  ;;  %v4389_v14 = vand.u32 4294901760, %v3002_v0  ;;  %v4396_v0 = vld [vmem:[#allocation7_spill] sm:$0xff] }
  0x7f   : > { %616 = vmatmul.mubr.f32.gmra.mrb[26].mxu0 %v615_v56  ;;  %962 = vmatmul.mubr.f32.gmra.mrb[24].mxu1 %v3560_v19  ;;  %v4373_v56 = vld [vmem:[#allocation34_spill] sm:$0xff]  ;;  %v4393_v46 = vand.u32 4294901760, %v4382_v9  ;;  %v4394_v47 = vand.u32 4294901760, %v3025_v17 }
  0x80   : > { %625 = vmatprep.mubr.f32.mxu0 %v624_v2  ;;  %967 = vmatprep.mubr.f32.mxu1 %v3570_v60  ;;  %v4375_v2 = vand.u32 4294901760, %v2944_v28  ;;  %v4384_v28 = vand.u32 4294901760, %v4373_v56  ;;  %v2754_v57 = vpack.c.bf16 %v4386_v40, %v4385_v29  ;;  %v4412_v40 = vld [vmem:[#allocation49_spill] sm:$0xff] }
  0x83   : > { %631 = vmatmul.mubr.f32.gmra.mrb[28].mxu0 %v630_v11  ;;  %969 = vmatmul.mubr.f32.gmra.mrb[26].mxu1 %v3580_v33  ;;  %v2750_v11 = vpack.c.bf16 %v4376_v24, %v4375_v2  ;;  %v4397_v2 = vand.u32 4294901760, %v3043_v51  ;;  %v4398_v24 = vand.u32 4294901760, %v3045_v52  ;;  %v4407_v52 = vld [vmem:[#allocation9_spill] sm:$0xff] }
  0x84   : > { %640 = vmatprep.mubr.f32.mxu0 %v639_v58  ;;  %974 = vmatprep.mubr.f32.mxu1 %v3616_v30  ;;  %v2752_v58 = vpack.c.bf16 %v4379_v54, %v4377_v23  ;;  %v4399_v23 = vld [vmem:[#allocation45_spill] sm:$0xff] }
  0x87   : > { %646 = vmatmul.mubr.f32.gmra.mrb[30].mxu0 %v645_v20  ;;  %976 = vmatmul.mubr.f32.gmra.mrb[28].mxu1 %v3622_v22  ;;  %v4380_v20 = vld [vmem:[#allocation36_spill] sm:$0xff] }
  0x88   : > { %1118 = vmatprep.mubr.f32.mxu0 %v4365_v15  ;;  %981 = vmatprep.mubr.f32.mxu1 %v3624_v48  ;;  %v4383_v15 = vld [vmem:[#allocation3_spill] sm:$0xff] }
  0x8b   : > { %1121 = vmatmul.mubr.f32.vlgmr.msra.gmra.mrb[32].mxu0 %v4372_v38  ;;  %983 = vmatmul.mubr.f32.gmra.mrb[30].mxu1 %v3649_v25  ;;  %v4391_v38 = vand.u32 4294901760, %v4380_v20 }
  0x8c   : > { %1127 = vmatprep.mubr.f32.mxu0 %v4373_v56  ;;  %1360 = vmatprep.mubr.f32.mxu1 %v4374_v49  ;;  %v4392_v56 = vld [vmem:[#allocation44_spill] sm:$0xff] }
  0x8d   : > { %2747 = vmatpush3.bf16.msra.mxu0 %v2746_v34  ;;  %v4388_v34 = vand.u32 4294901760, %v2998_v61  ;;  %v4395_v61 = vand.u32 4294901760, %v3027_v18  ;;  %v4402_v17 = vand.u32 4294901760, %v4392_v56  ;;  %v4403_v18 = vld [vmem:[#allocation12_spill] sm:$0xff] }
  0x8e   : > { %2749 = vmatprep.subr.bf16.mxu0 %v2748_v7  ;;  %v4390_v7 = vld [vmem:[#allocation42_spill] sm:$0xff]  ;;  %v4404_v54 = vand.u32 4294901760, %v4403_v18 }
  0x8f   : > { %1130 = vmatmul.mubr.f32.gmra.mrb[34].mxu0 %v4380_v20  ;;  %1364 = vmatmul.mubr.f32.vlgmr.msra.gmra.mrb[32].mxu1 %v4381_v10  ;;  %v2756_v4 = vpack.c.bf16 %v4389_v14, %v4388_v34  ;;  %v2758_v49 = vpack.c.bf16 %v4395_v61, %v4394_v47  ;;  %v4400_v26 = vand.u32 4294901760, %v4390_v7  ;;  %v4408_v10 = vld [vmem:[#allocation16_spill] sm:$0xff]  ;;  %v4416_v34 = vld [vmem:[#allocation10_spill] sm:$0xff]  ;;  %v4417_v14 = vld [vmem:[#allocation11_spill] sm:$0xff] }
  0x90   : > { %1136 = vmatprep.mubr.f32.mxu0 %v4382_v9  ;;  %2779 = vmatpush3.bf16.msra.mxu1 %v4383_v15  ;;  %v4409_v9 = vand.u32 4294901760, %v4408_v10  ;;  %v4410_v15 = vld [vmem:[#allocation17_spill] sm:$0xff]  ;;  %v4423_v47 = vld [vmem:[#allocation15_spill] sm:$0xff]  ;;  %v4424_v61 = vld [vmem:[#allocation58_spill] sm:$0xff] }
  0x91   : > { %1371 = vmatprep.mubr.f32.mxu1 %v4384_v28  ;;  %2751 = vmatpush3.bf16.msra.mxu0 %v2750_v11  ;;  %v2760_v11 = vpack.c.bf16 %v4398_v24, %v4397_v2  ;;  %v4411_v28 = vand.u32 4294901760, %v4410_v15  ;;  %v4428_v24 = vld [vmem:[#allocation18_spill] sm:$0xff]  ;;  %v4449_v15 = vld [vmem:[#allocation72_spill] sm:$0xff] }
  0x92   : > { %2781 = vmatprep.subr.bf16.mxu1 %v4387_v59  ;;  %2753 = vmatprep.subr.bf16.mxu0 %v2752_v58  ;;  %v4405_v58 = vld [vmem:[#allocation14_spill] sm:$0xff] }
  0x93   : > { %1139 = vmatmul.mubr.f32.gmra.mrb[36].mxu0 %v4390_v7  ;;  %1375 = vmatmul.mubr.f32.gmra.mrb[34].mxu1 %v4391_v38  ;;  %v4406_v51 = vand.u32 4294901760, %v4405_v58  ;;  %v2764_v29 = vpack.c.bf16 %v4411_v28, %v4409_v9  ;;  %v4419_v7 = vand.u32 4294901760, %v4412_v40  ;;  %v4420_v38 = vld [vmem:[#allocation56_spill] sm:$0xff] }
  0x94   : > { %1145 = vmatprep.mubr.f32.mxu0 %v4392_v56  ;;  %1382 = vmatprep.mubr.f32.mxu1 %v4393_v46  ;;  %v4422_v46 = vld [vmem:[#allocation13_spill] sm:$0xff]  ;;  %v4427_v2 = vand.u32 4294901760, %v4420_v38 }
  0x95   : > { %2783 = vmatpush3.bf16.msra.mxu1 %v2942_v27  ;;  %2755 = vmatpush3.bf16.msra.mxu0 %v2754_v57  ;;  %v4401_v27 = vld [vmem:[#allocation46_spill] sm:$0xff]  ;;  %v2762_v20 = vpack.c.bf16 %v4406_v51, %v4404_v54  ;;  %v4413_v57 = vand.u32 4294901760, %v4399_v23  ;;  %v4439_v54 = vld [vmem:[#allocation67_spill] sm:$0xff]  ;;  %v4443_v51 = vld [vmem:[#allocation69_spill] sm:$0xff] }
  0x96   : > { %2785 = vmatprep.subr.bf16.mxu1 %v4396_v0  ;;  %2757 = vmatprep.subr.bf16.mxu0 %v2756_v4  ;;  %v4415_v59 = vand.u32 4294901760, %v4401_v27  ;;  %v4418_v4 = vld [vmem:[#allocation52_spill] sm:$0xff]  ;;  %v4426_v0 = vld [vmem:[#allocation59_spill] sm:$0xff]  ;;  %v4448_v9 = vand.u32 4294901760, %v4443_v51 }
  0x97   : > { %1148 = vmatmul.mubr.f32.gmra.mrb[38].mxu0 %v4399_v23  ;;  %1386 = vmatmul.mubr.f32.gmra.mrb[36].mxu1 %v4400_v26  ;;  %v4432_v23 = vld [vmem:[#allocation63_spill] sm:$0xff]  ;;  %v4433_v26 = vand.u32 4294901760, %v4426_v0 }
  0x98   : > { %1154 = vmatprep.mubr.f32.mxu0 %v4401_v27  ;;  %1393 = vmatprep.mubr.f32.mxu1 %v4402_v17  ;;  %v4434_v27 = vld [vmem:[#allocation22_spill] sm:$0xff]  ;;  %v4438_v18 = vand.u32 4294901760, %v4432_v23 }
  0x99   : > { %2787 = vmatpush3.bf16.msra.mxu1 %v2970_v45  ;;  %2759 = vmatpush3.bf16.msra.mxu0 %v2758_v49  ;;  %v4414_v45 = vld [vmem:[#allocation50_spill] sm:$0xff]  ;;  %v4425_v49 = vand.u32 4294901760, %v4418_v4 }
  0x9a   : > { %2789 = vmatprep.subr.bf16.mxu1 %v4407_v52  ;;  %2761 = vmatprep.subr.bf16.mxu0 %v2760_v11  ;;  %v4421_v56 = vand.u32 4294901760, %v4414_v45  ;;  %v4429_v11 = vld [vmem:[#allocation19_spill] sm:$0xff]  ;;  %v4437_v17 = vld [vmem:[#allocation66_spill] sm:$0xff] }
  0x9b   : > { %1157 = vmatmul.mubr.f32.gmra.mrb[40].mxu0 %v4412_v40  ;;  %1397 = vmatmul.mubr.f32.gmra.mrb[38].mxu1 %v4413_v57  ;;  %v4445_v52 = vld [vmem:[#allocation70_spill] sm:$0xff]  ;;  %v4452_v40 = vand.u32 4294901760, %v4449_v15  ;;  %v4453_v57 = vand.u32 4294901760, %v3578_v12 }
  0x9c   : > { %1163 = vmatprep.mubr.f32.mxu0 %v4414_v45  ;;  %1404 = vmatprep.mubr.f32.mxu1 %v4415_v59  ;;  %v4450_v28 = vand.u32 4294901760, %v4445_v52  ;;  %v4454_v45 = vand.u32 4294901760, %v3592_v5  ;;  %v4455_v59 = vand.u32 4294901760, %v3629_v55 }
  0x9d   : > { %2791 = vmatpush3.bf16.msra.mxu1 %v4416_v34  ;;  %2763 = vmatpush3.bf16.msra.mxu0 %v2762_v20  ;;  %v4444_v20 = vand.u32 4294901760, %v4439_v54  ;;  %v4467_v34 = vld [vmem:[#allocation51_spill] sm:$0xff] }
  0x9e   : > { %2793 = vmatprep.subr.bf16.mxu1 %v4417_v14  ;;  %2765 = vmatprep.subr.bf16.mxu0 %v2764_v29  ;;  %v4468_v14 = vld [vmem:[#allocation53_spill] sm:$0xff] }
  0x9f   : > { %1166 = vmatmul.mubr.f32.gmra.mrb[42].mxu0 %v4418_v4  ;;  %1408 = vmatmul.mubr.f32.gmra.mrb[40].mxu1 %v4419_v7  ;;  %v4469_v4 = vld [vmem:[#allocation54_spill] sm:$0xff]  ;;  %v4470_v7 = vld [vmem:[#allocation55_spill] sm:$0xff] }
  0xa0   : > { %1172 = vmatprep.mubr.f32.mxu0 %v4420_v38  ;;  %1415 = vmatprep.mubr.f32.mxu1 %v4421_v56  ;;  %v4471_v38 = vld [vmem:[#allocation57_spill] sm:$0xff] }
  0xa1   : > { %2795 = vmatpush3.bf16.msra.mxu1 %v4422_v46  ;;  %2767 = vmatpush3.bf16.msra.mxu0 %v3668_v35  ;;  %v4430_v35 = vld [vmem:[#allocation60_spill] sm:$0xff]  ;;  %v4472_v56 = vld [vmem:[#allocation61_spill] sm:$0xff]  ;;  %v4473_v46 = vld [vmem:[#allocation62_spill] sm:$0xff] }
  0xa2   : > { %2797 = vmatprep.subr.bf16.mxu1 %v4423_v47  ;;  %2769 = vmatprep.subr.bf16.mxu0 %v3679_v36  ;;  %v4431_v36 = vand.u32 4294901760, %v4424_v61  ;;  %v4474_v47 = vld [vmem:[#allocation64_spill] sm:$0xff] }
  0xa3   : > { %1175 = vmatmul.mubr.f32.gmra.mrb[44].mxu0 %v4424_v61  ;;  %1419 = vmatmul.mubr.f32.gmra.mrb[42].mxu1 %v4425_v49 }
  0xa4   : > { %1181 = vmatprep.mubr.f32.mxu0 %v4426_v0  ;;  %1426 = vmatprep.mubr.f32.mxu1 %v4427_v2 }
  0xa5   : > { %2799 = vmatpush3.bf16.msra.mxu1 %v4428_v24  ;;  %2771 = vmatpush3.bf16.msra.mxu0 %v3685_v63  ;;  %v4435_v63 = vld [vmem:[#allocation65_spill] sm:$0xff] }
  0xa6   : > { %2801 = vmatprep.subr.bf16.mxu1 %v4429_v11  ;;  %2773 = vmatprep.subr.bf16.mxu0 %v3691_v21  ;;  %v4436_v21 = vand.u32 4294901760, %v4430_v35  ;;  %v4440_v58 = vand.u32 4294901760, %v4435_v63 }
  0xa7   : > { %1184 = vmatmul.mubr.f32.gmra.mrb[46].mxu0 %v4430_v35  ;;  %1430 = vmatmul.mubr.f32.gmra.mrb[44].mxu1 %v4431_v36 }
  0xa8   : > { %1190 = vmatprep.mubr.f32.mxu0 %v4432_v23  ;;  %1437 = vmatprep.mubr.f32.mxu1 %v4433_v26 }
  0xa9   : > { %2803 = vmatpush3.bf16.msra.mxu1 %v4434_v27  ;;  %2775 = vmatpush3.bf16.msra.mxu0 %v3697_v32  ;;  %v4441_v32 = vld [vmem:[#allocation68_spill] sm:$0xff] }
  0xaa   : > { %2805 = vmatprep.subr.bf16.mxu1 %v4345_v41  ;;  %v4442_v41 = vand.u32 4294901760, %v4437_v17  ;;  %v4446_v10 = vand.u32 4294901760, %v4441_v32 }
  0xab   : > { %1193 = vmatmul.mubr.f32.gmra.mrb[48].mxu0 %v4435_v63  ;;  %1441 = vmatmul.mubr.f32.gmra.mrb[46].mxu1 %v4436_v21 }
  0xac   : > { %1199 = vmatprep.mubr.f32.mxu0 %v4437_v17  ;;  %1448 = vmatprep.mubr.f32.mxu1 %v4438_v18 }
  0xad   : > { %2807 = vmatpush3.bf16.msra.mxu1 %v4346_v62  ;;  %v4447_v62 = vld [vmem:[#allocation71_spill] sm:$0xff] }
  0xae   : > { %v4451_v29 = vand.u32 4294901760, %v4447_v62 }
  0xaf   : > { %1202 = vmatmul.mubr.f32.gmra.mrb[50].mxu0 %v4439_v54  ;;  %1452 = vmatmul.mubr.f32.gmra.mrb[48].mxu1 %v4440_v58 }
  0xb0   : > { %1208 = vmatprep.mubr.f32.mxu0 %v4441_v32  ;;  %1459 = vmatprep.mubr.f32.mxu1 %v4442_v41 }
  0xb3   : > { %1211 = vmatmul.mubr.f32.gmra.mrb[52].mxu0 %v4443_v51  ;;  %1463 = vmatmul.mubr.f32.gmra.mrb[50].mxu1 %v4444_v20 }
  0xb4   : > { %1217 = vmatprep.mubr.f32.mxu0 %v4445_v52  ;;  %1470 = vmatprep.mubr.f32.mxu1 %v4446_v10 }
  0xb7   : > { %1220 = vmatmul.mubr.f32.gmra.mrb[54].mxu0 %v4447_v62  ;;  %1474 = vmatmul.mubr.f32.gmra.mrb[52].mxu1 %v4448_v9 }
  0xb8   : > { %1226 = vmatprep.mubr.f32.mxu0 %v4449_v15  ;;  %1481 = vmatprep.mubr.f32.mxu1 %v4450_v28 }
  0xbb   : > { %1229 = vmatmul.mubr.f32.gmra.mrb[56].mxu0 %v3578_v12  ;;  %1485 = vmatmul.mubr.f32.gmra.mrb[54].mxu1 %v4451_v29  ;;  %v4456_v12 = vld [vmem:[#allocation29_spill] sm:$0xff] }
  0xbc   : > { %1235 = vmatprep.mubr.f32.mxu0 %v3592_v5  ;;  %1492 = vmatprep.mubr.f32.mxu1 %v4452_v40  ;;  %v4457_v5 = vld [vmem:[#allocation30_spill] sm:$0xff] }
  0xbf   : > { %1238 = vmatmul.mubr.f32.gmra.mrb[58].mxu0 %v3611_v3  ;;  %1496 = vmatmul.mubr.f32.gmra.mrb[56].mxu1 %v4453_v57  ;;  %v4458_v3 = vld [vmem:[#allocation33_spill] sm:$0xff] }
  0xc0   : > { %1244 = vmatprep.mubr.f32.mxu0 %v3629_v55  ;;  %1503 = vmatprep.mubr.f32.mxu1 %v4454_v45  ;;  %v4459_v55 = vld [vmem:[#allocation35_spill] sm:$0xff] }
  0xc3   : > { %1247 = vmatmul.mubr.f32.gmra.mrb[60].mxu0 %v3647_v37  ;;  %1507 = vmatmul.mubr.f32.gmra.mrb[58].mxu1 %v613_v13  ;;  %v4460_v37 = vld [vmem:[#allocation37_spill] sm:$0xff]  ;;  %v4461_v13 = vld [vmem:[#allocation39_spill] sm:$0xff] }
  0xc4   : > { %1253 = vmatprep.mubr.f32.mxu0 %v3654_v16  ;;  %1514 = vmatprep.mubr.f32.mxu1 %v4455_v59  ;;  %v4462_v16 = vld [vmem:[#allocation40_spill] sm:$0xff] }
  0xc7   : > { %1256 = vmatmul.mubr.f32.gmra.mrb[62].mxu0 %v3662_v39  ;;  %1518 = vmatmul.mubr.f32.gmra.mrb[60].mxu1 %v628_v43  ;;  %v4463_v43 = vld [vmem:[#allocation41_spill] sm:$0xff]  ;;  %v4464_v39 = vld [vmem:[#allocation43_spill] sm:$0xff] }
  0xc8   : > { %1695 = vmatprep.mubr.f32.mxu0 %v4456_v12  ;;  %1525 = vmatprep.mubr.f32.mxu1 %v637_v50  ;;  %v4465_v50 = vld [vmem:[#allocation47_spill] sm:$0xff] }
  0xcb   : > { %1697 = vmatmul.mubr.f32.vlgmr.msra.gmra.mrb[64].mxu0 %v4457_v5  ;;  %1529 = vmatmul.mubr.f32.gmra.mrb[62].mxu1 %v643_v53  ;;  %v4466_v53 = vld [vmem:[#allocation48_spill] sm:$0xff] }
  0xcc   : > { %1702 = vmatprep.mubr.f32.mxu0 %v4458_v3  ;;  %1904 = vmatprep.mubr.f32.mxu1 %v4456_v12 }
  0xcf   : > { %1704 = vmatmul.mubr.f32.gmra.mrb[66].mxu0 %v4459_v55  ;;  %1906 = vmatmul.mubr.f32.vlgmr.msra.gmra.mrb[64].mxu1 %v4457_v5 }
  0xd0   : > { %1709 = vmatprep.mubr.f32.mxu0 %v4460_v37  ;;  %1911 = vmatprep.mubr.f32.mxu1 %v4458_v3 }
  0xd3   : > { %1711 = vmatmul.mubr.f32.gmra.mrb[68].mxu0 %v4461_v13  ;;  %1913 = vmatmul.mubr.f32.gmra.mrb[66].mxu1 %v4459_v55 }
  0xd4   : > { %1716 = vmatprep.mubr.f32.mxu0 %v4462_v16  ;;  %1918 = vmatprep.mubr.f32.mxu1 %v4460_v37 }
  0xd7   : > { %1718 = vmatmul.mubr.f32.gmra.mrb[70].mxu0 %v4463_v43  ;;  %1920 = vmatmul.mubr.f32.gmra.mrb[68].mxu1 %v4461_v13 }
  0xd8   : > { %1723 = vmatprep.mubr.f32.mxu0 %v4464_v39  ;;  %1925 = vmatprep.mubr.f32.mxu1 %v4462_v16 }
  0xdb   : > { %1725 = vmatmul.mubr.f32.gmra.mrb[72].mxu0 %v4465_v50  ;;  %1927 = vmatmul.mubr.f32.gmra.mrb[70].mxu1 %v4463_v43 }
  0xdc   : > { %1730 = vmatprep.mubr.f32.mxu0 %v4466_v53  ;;  %1932 = vmatprep.mubr.f32.mxu1 %v4464_v39 }
  0xdf   : > { %1732 = vmatmul.mubr.f32.gmra.mrb[74].mxu0 %v4467_v34  ;;  %1934 = vmatmul.mubr.f32.gmra.mrb[72].mxu1 %v4465_v50 }
  0xe0   : > { %1737 = vmatprep.mubr.f32.mxu0 %v4468_v14  ;;  %1939 = vmatprep.mubr.f32.mxu1 %v4466_v53 }
  0xe3   : > { %1739 = vmatmul.mubr.f32.gmra.mrb[76].mxu0 %v4469_v4  ;;  %1941 = vmatmul.mubr.f32.gmra.mrb[74].mxu1 %v4467_v34 }
  0xe4   : > { %1744 = vmatprep.mubr.f32.mxu0 %v4470_v7  ;;  %1946 = vmatprep.mubr.f32.mxu1 %v4468_v14 }
  0xe7   : > { %1746 = vmatmul.mubr.f32.gmra.mrb[78].mxu0 %v4471_v38  ;;  %1948 = vmatmul.mubr.f32.gmra.mrb[76].mxu1 %v4469_v4 }
  0xe8   : > { %1751 = vmatprep.mubr.f32.mxu0 %v4472_v56  ;;  %1953 = vmatprep.mubr.f32.mxu1 %v4470_v7 }
  0xeb   : > { %1753 = vmatmul.mubr.f32.gmra.mrb[80].mxu0 %v4473_v46  ;;  %1955 = vmatmul.mubr.f32.gmra.mrb[78].mxu1 %v4471_v38 }
  0xec   : > { %1758 = vmatprep.mubr.f32.mxu0 %v4474_v47  ;;  %1960 = vmatprep.mubr.f32.mxu1 %v4472_v56 }
  0xef   : > { %1760 = vmatmul.mubr.f32.gmra.mrb[82].mxu0 %v3464_v1  ;;  %1962 = vmatmul.mubr.f32.gmra.mrb[80].mxu1 %v4473_v46 }
  0xf0   : > { %1765 = vmatprep.mubr.f32.mxu0 %v3514_v31  ;;  %1967 = vmatprep.mubr.f32.mxu1 %v4474_v47 }
  0xf3   : > { %1767 = vmatmul.mubr.f32.gmra.mrb[84].mxu0 %v3521_v44  ;;  %1969 = vmatmul.mubr.f32.gmra.mrb[82].mxu1 %v3464_v1 }
  0xf4   : > { %1772 = vmatprep.mubr.f32.mxu0 %v3523_v8  ;;  %1974 = vmatprep.mubr.f32.mxu1 %v3514_v31 }
  0xf7   : > { %1774 = vmatmul.mubr.f32.gmra.mrb[86].mxu0 %v3538_v42  ;;  %1976 = vmatmul.mubr.f32.gmra.mrb[84].mxu1 %v3521_v44 }
  0xf8   : > { %1779 = vmatprep.mubr.f32.mxu0 %v3554_v6  ;;  %1981 = vmatprep.mubr.f32.mxu1 %v3523_v8 }
  0xfb   : > { %1781 = vmatmul.mubr.f32.gmra.mrb[88].mxu0 %v3560_v19  ;;  %1983 = vmatmul.mubr.f32.gmra.mrb[86].mxu1 %v3538_v42 }
  0xfc   : > { %1786 = vmatprep.mubr.f32.mxu0 %v3570_v60  ;;  %1988 = vmatprep.mubr.f32.mxu1 %v3554_v6 }
  0xff   : > { %1788 = vmatmul.mubr.f32.gmra.mrb[90].mxu0 %v3580_v33  ;;  %1990 = vmatmul.mubr.f32.gmra.mrb[88].mxu1 %v3560_v19 }
 0x100   : > { %1793 = vmatprep.mubr.f32.mxu0 %v3616_v30  ;;  %1995 = vmatprep.mubr.f32.mxu1 %v3570_v60 }
 0x103   : > { %1795 = vmatmul.mubr.f32.gmra.mrb[92].mxu0 %v3622_v22  ;;  %1997 = vmatmul.mubr.f32.gmra.mrb[90].mxu1 %v3580_v33 }
 0x104   : > { %1800 = vmatprep.mubr.f32.mxu0 %v3624_v48  ;;  %2002 = vmatprep.mubr.f32.mxu1 %v3616_v30 }
 0x107   : > { %1802 = vmatmul.mubr.f32.gmra.mrb[94].mxu0 %v3649_v25  ;;  %2004 = vmatmul.mubr.f32.gmra.mrb[92].mxu1 %v3622_v22 }
 0x108   : > { %2009 = vmatprep.mubr.f32.mxu1 %v3624_v48 }
 0x10b   : > { %2011 = vmatmul.mubr.f32.gmra.mrb[94].mxu1 %v3649_v25 }
 0x117   : > { %v2168_v6 = vpop.f32.mrb[0].mxu0 }
 0x118   : > { %v2169_v1 = vpop.f32.mrb[1].mxu0 }
 0x119   : > { %v2170_v31 = vadd.f32 %v2169_v1, %v2168_v6 }
 0x11d   : > { %v2171_v44 = vpop.f32.mrb[2].mxu0 }
 0x11e   : > { %v2172_v8 = vpop.f32.mrb[3].mxu0 }
 0x11f   : > { %v2173_v42 = vadd.f32 %v2172_v8, %v2171_v44 }
 0x121   : > { %v2248_v19 = vpop.f32.mrb[0].mxu1 }
 0x122   : > { %v2249_v60 = vpop.f32.mrb[1].mxu1 }
 0x123   : > { %v2250_v33 = vadd.f32 %v2249_v60, %v2248_v19 }
 0x125   : > { %v3938_v61 = vadd.f32 %v2250_v33, %v2170_v31  ;;  %v2251_v30 = vpop.f32.mrb[2].mxu1  ;;  %v2174_v49 = vpop.f32.mrb[4].mxu0 }
 0x126   : > { %v2252_v0 = vpop.f32.mrb[3].mxu1  ;;  %v2175_v2 = vpop.f32.mrb[5].mxu0 }
 0x127   : > { %v2253_v22 = vadd.f32 %v2252_v0, %v2251_v30  ;;  %v2176_v24 = vadd.f32 %v2175_v2, %v2174_v49 }
 0x129   : > { %v3940_v48 = vadd.f32 %v2253_v22, %v2173_v42  ;;  %v2254_v25 = vpop.f32.mrb[4].mxu1  ;;  %v2177_v11 = vpop.f32.mrb[6].mxu0 }
 0x12a   : > { %v2255_v35 = vpop.f32.mrb[5].mxu1  ;;  %v2178_v36 = vpop.f32.mrb[7].mxu0 }
 0x12b   : > { %v2256_v23 = vadd.f32 %v2255_v35, %v2254_v25  ;;  %v2179_v26 = vadd.f32 %v2178_v36, %v2177_v11 }
 0x12d   : > { %v3942_v27 = vadd.f32 %v2256_v23, %v2176_v24  ;;  %v2180_v21 = vpop.f32.mrb[8].mxu0 }
 0x12e   : > { %v2257_v63 = vpop.f32.mrb[6].mxu1  ;;  %v2181_v18 = vpop.f32.mrb[9].mxu0 }
 0x12f   : > { %v2258_v17 = vpop.f32.mrb[7].mxu1  ;;  %v2182_v58 = vadd.f32 %v2181_v18, %v2180_v21 }
 0x130   : > { %v2259_v54 = vadd.f32 %v2258_v17, %v2257_v63 }
 0x131   : > { %v2183_v51 = vpop.f32.mrb[10].mxu0 }
 0x132   : > { %v3944_v32 = vadd.f32 %v2259_v54, %v2179_v26  ;;  %v2260_v41 = vpop.f32.mrb[8].mxu1  ;;  %v2184_v52 = vpop.f32.mrb[11].mxu0 }
 0x133   : > { %v2261_v20 = vpop.f32.mrb[9].mxu1  ;;  %v2185_v62 = vadd.f32 %v2184_v52, %v2183_v51 }
 0x134   : > { %v2262_v10 = vadd.f32 %v2261_v20, %v2260_v41 }
 0x136   : > { %v3946_v9 = vadd.f32 %v2262_v10, %v2182_v58  ;;  %v2263_v15 = vpop.f32.mrb[10].mxu1  ;;  %v2186_v28 = vpop.f32.mrb[12].mxu0 }
 0x137   : > { %v2264_v29 = vpop.f32.mrb[11].mxu1  ;;  %v2187_v40 = vpop.f32.mrb[13].mxu0 }
 0x138   : > { %v2265_v57 = vadd.f32 %v2264_v29, %v2263_v15  ;;  %v2188_v45 = vadd.f32 %v2187_v40, %v2186_v28 }
 0x13a   : > { %v3948_v59 = vadd.f32 %v2265_v57, %v2185_v62  ;;  %v2266_v12 = vpop.f32.mrb[12].mxu1  ;;  %v2189_v5 = vpop.f32.mrb[14].mxu0 }
 0x13b   : > { %v2267_v3 = vpop.f32.mrb[13].mxu1  ;;  %v2190_v55 = vpop.f32.mrb[15].mxu0 }
 0x13c   : > { %v2268_v37 = vadd.f32 %v2267_v3, %v2266_v12  ;;  %v2191_v13 = vadd.f32 %v2190_v55, %v2189_v5 }
 0x13e   : > { %v3950_v16 = vadd.f32 %v2268_v37, %v2188_v45  ;;  %v2269_v43 = vpop.f32.mrb[14].mxu1  ;;  %v2192_v39 = vpop.f32.mrb[16].mxu0 }
 0x13f   : > { %v2270_v50 = vpop.f32.mrb[15].mxu1  ;;  %v2193_v53 = vpop.f32.mrb[17].mxu0 }
 0x140   : > { %v2271_v34 = vadd.f32 %v2270_v50, %v2269_v43  ;;  %v2194_v14 = vadd.f32 %v2193_v53, %v2192_v39 }
 0x142   : > { %v3952_v4 = vadd.f32 %v2271_v34, %v2191_v13  ;;  %v2272_v7 = vpop.f32.mrb[16].mxu1  ;;  %v2195_v38 = vpop.f32.mrb[18].mxu0 }
 0x143   : > { %v2273_v56 = vpop.f32.mrb[17].mxu1  ;;  %v2196_v46 = vpop.f32.mrb[19].mxu0 }
 0x144   : > { %v2274_v47 = vadd.f32 %v2273_v56, %v2272_v7  ;;  %v2197_v6 = vadd.f32 %v2196_v46, %v2195_v38 }
 0x146   : > { %v3954_v1 = vadd.f32 %v2274_v47, %v2194_v14  ;;  %v2275_v31 = vpop.f32.mrb[18].mxu1  ;;  %v2198_v44 = vpop.f32.mrb[20].mxu0 }
 0x147   : > { %v2276_v8 = vpop.f32.mrb[19].mxu1  ;;  %v2199_v42 = vpop.f32.mrb[21].mxu0 }
 0x148   : > { %v2277_v19 = vadd.f32 %v2276_v8, %v2275_v31  ;;  %v2200_v60 = vadd.f32 %v2199_v42, %v2198_v44 }
 0x14a   : > { %v3956_v33 = vadd.f32 %v2277_v19, %v2197_v6  ;;  %v2278_v30 = vpop.f32.mrb[20].mxu1  ;;  %v2201_v49 = vpop.f32.mrb[22].mxu0 }
 0x14b   : > { %v2279_v0 = vpop.f32.mrb[21].mxu1  ;;  %v2202_v2 = vpop.f32.mrb[23].mxu0 }
 0x14c   : > { %v2280_v22 = vadd.f32 %v2279_v0, %v2278_v30  ;;  %v2203_v24 = vadd.f32 %v2202_v2, %v2201_v49 }
 0x14e   : > { %v3958_v25 = vadd.f32 %v2280_v22, %v2200_v60  ;;  %v2281_v11 = vpop.f32.mrb[22].mxu1  ;;  %v2204_v35 = vpop.f32.mrb[24].mxu0 }
 0x14f   : > { %v2282_v36 = vpop.f32.mrb[23].mxu1  ;;  %v2205_v23 = vpop.f32.mrb[25].mxu0 }
 0x150   : > { %v2283_v26 = vadd.f32 %v2282_v36, %v2281_v11  ;;  %v2206_v63 = vadd.f32 %v2205_v23, %v2204_v35 }
 0x152   : > { %v3960_v21 = vadd.f32 %v2283_v26, %v2203_v24  ;;  %v2284_v17 = vpop.f32.mrb[24].mxu1  ;;  %v2207_v18 = vpop.f32.mrb[26].mxu0 }
 0x153   : > { %v2285_v54 = vpop.f32.mrb[25].mxu1  ;;  %v2208_v58 = vpop.f32.mrb[27].mxu0 }
 0x154   : > { %v2286_v41 = vadd.f32 %v2285_v54, %v2284_v17  ;;  %v2209_v51 = vadd.f32 %v2208_v58, %v2207_v18 }
 0x156   : > { %v3962_v20 = vadd.f32 %v2286_v41, %v2206_v63  ;;  %v2210_v52 = vpop.f32.mrb[28].mxu0  ;;  %v2287_v10 = vpop.f32.mrb[26].mxu1 }
 0x157   : > { %v2211_v62 = vpop.f32.mrb[29].mxu0  ;;  %v2288_v15 = vpop.f32.mrb[27].mxu1 }
 0x158   : > { %v2212_v28 = vadd.f32 %v2211_v62, %v2210_v52  ;;  %v2289_v29 = vadd.f32 %v2288_v15, %v2287_v10 }
 0x15a   : > { %v3964_v40 = vadd.f32 %v2289_v29, %v2209_v51  ;;  %v2213_v57 = vpop.f32.mrb[30].mxu0  ;;  %v2290_v45 = vpop.f32.mrb[28].mxu1 }
 0x15b   : > { %v2214_v12 = vpop.f32.mrb[31].mxu0  ;;  %v2291_v5 = vpop.f32.mrb[29].mxu1 }
 0x15c   : > { %v2215_v3 = vadd.f32 %v2214_v12, %v2213_v57  ;;  %v2292_v55 = vadd.f32 %v2291_v5, %v2290_v45 }
 0x15e   : > { %v2328_v37 = vpop.f32.mrb[32].mxu0  ;;  %v3966_v13 = vadd.f32 %v2292_v55, %v2212_v28  ;;  %v2293_v43 = vpop.f32.mrb[30].mxu1 }
 0x15f   : > { %v2329_v39 = vpop.f32.mrb[33].mxu0  ;;  %v2294_v50 = vpop.f32.mrb[31].mxu1 }
 0x160   : > { %v2330_v53 = vadd.f32 %v2329_v39, %v2328_v37  ;;  %v2295_v34 = vadd.f32 %v2294_v50, %v2293_v43 }
 0x162   : > { %v1123_v14 = vadd.f32 %v2330_v53, %v3938_v61  ;;  %v2331_v7 = vpop.f32.mrb[34].mxu0  ;;  %v3969_v38 = vadd.f32 %v2295_v34, %v2215_v3  ;;  %v2408_v56 = vpop.f32.mrb[32].mxu1 }
 0x163   : > { %v2332_v46 = vpop.f32.mrb[35].mxu0  ;;  %v2409_v47 = vpop.f32.mrb[33].mxu1 }
 0x164   : > { %v2333_v6 = vadd.f32 %v2332_v46, %v2331_v7  ;;  %v2410_v31 = vadd.f32 %v2409_v47, %v2408_v56 }
 0x166   : > { %v1132_v44 = vadd.f32 %v2333_v6, %v3940_v48  ;;  %v2334_v8 = vpop.f32.mrb[36].mxu0  ;;  %v3972_v42 = vadd.f32 %v2410_v31, %v1123_v14  ;;  %v2411_v19 = vpop.f32.mrb[34].mxu1 }
 0x167   : > { %v2335_v60 = vpop.f32.mrb[37].mxu0  ;;  %v2412_v30 = vpop.f32.mrb[35].mxu1 }
 0x168   : > { %v2336_v49 = vadd.f32 %v2335_v60, %v2334_v8  ;;  %v2413_v0 = vadd.f32 %v2412_v30, %v2411_v19 }
 0x16a   : > { %v1141_v61 = vadd.f32 %v2336_v49, %v3942_v27  ;;  %v2337_v2 = vpop.f32.mrb[38].mxu0  ;;  %v3975_v22 = vadd.f32 %v2413_v0, %v1132_v44  ;;  %v2414_v24 = vpop.f32.mrb[36].mxu1 }
 0x16b   : > { %v2338_v11 = vpop.f32.mrb[39].mxu0  ;;  %v2415_v35 = vpop.f32.mrb[37].mxu1 }
 0x16c   : > { %v2339_v36 = vadd.f32 %v2338_v11, %v2337_v2  ;;  %v2416_v23 = vadd.f32 %v2415_v35, %v2414_v24 }
 0x16e   : > { %v1150_v48 = vadd.f32 %v2339_v36, %v3944_v32  ;;  %v2340_v26 = vpop.f32.mrb[40].mxu0  ;;  %v3978_v63 = vadd.f32 %v2416_v23, %v1141_v61  ;;  %v2417_v17 = vpop.f32.mrb[38].mxu1 }
 0x16f   : > { %v2341_v18 = vpop.f32.mrb[41].mxu0  ;;  %v2418_v54 = vpop.f32.mrb[39].mxu1 }
 0x170   : > { %v2342_v58 = vadd.f32 %v2341_v18, %v2340_v26  ;;  %v2419_v41 = vadd.f32 %v2418_v54, %v2417_v17 }
 0x172   : > { %v1159_v27 = vadd.f32 %v2342_v58, %v3946_v9  ;;  %v2343_v51 = vpop.f32.mrb[42].mxu0  ;;  %v3981_v52 = vadd.f32 %v2419_v41, %v1150_v48  ;;  %v2420_v10 = vpop.f32.mrb[40].mxu1 }
 0x173   : > { %v2344_v62 = vpop.f32.mrb[43].mxu0  ;;  %v2421_v15 = vpop.f32.mrb[41].mxu1 }
 0x174   : > { %v2345_v28 = vadd.f32 %v2344_v62, %v2343_v51  ;;  %v2422_v29 = vadd.f32 %v2421_v15, %v2420_v10 }
 0x176   : > { %v1168_v32 = vadd.f32 %v2345_v28, %v3948_v59  ;;  %v2346_v57 = vpop.f32.mrb[44].mxu0  ;;  %v3984_v45 = vadd.f32 %v2422_v29, %v1159_v27  ;;  %v2423_v12 = vpop.f32.mrb[42].mxu1 }
 0x177   : > { %v2347_v5 = vpop.f32.mrb[45].mxu0  ;;  %v2424_v3 = vpop.f32.mrb[43].mxu1 }
 0x178   : > { %v2348_v55 = vadd.f32 %v2347_v5, %v2346_v57  ;;  %v2425_v37 = vadd.f32 %v2424_v3, %v2423_v12 }
 0x17a   : > { %v1177_v9 = vadd.f32 %v2348_v55, %v3950_v16  ;;  %v2349_v43 = vpop.f32.mrb[46].mxu0  ;;  %v3987_v39 = vadd.f32 %v2425_v37, %v1168_v32  ;;  %v2426_v50 = vpop.f32.mrb[44].mxu1 }
 0x17b   : > { %v2350_v53 = vpop.f32.mrb[47].mxu0  ;;  %v2427_v34 = vpop.f32.mrb[45].mxu1 }
 0x17c   : > { %v2351_v14 = vadd.f32 %v2350_v53, %v2349_v43  ;;  %v2428_v7 = vadd.f32 %v2427_v34, %v2426_v50 }
 0x17e   : > { %v1186_v59 = vadd.f32 %v2351_v14, %v3952_v4  ;;  %v2352_v56 = vpop.f32.mrb[48].mxu0  ;;  %v3990_v46 = vadd.f32 %v2428_v7, %v1177_v9  ;;  %v2429_v47 = vpop.f32.mrb[46].mxu1 }
 0x17f   : > { %v2353_v6 = vpop.f32.mrb[49].mxu0  ;;  %v2430_v31 = vpop.f32.mrb[47].mxu1 }
 0x180   : > { %v2354_v44 = vadd.f32 %v2353_v6, %v2352_v56  ;;  %v2431_v8 = vadd.f32 %v2430_v31, %v2429_v47 }
 0x182   : > { %v1195_v16 = vadd.f32 %v2354_v44, %v3954_v1  ;;  %v2355_v19 = vpop.f32.mrb[50].mxu0  ;;  %v3993_v60 = vadd.f32 %v2431_v8, %v1186_v59  ;;  %v2432_v30 = vpop.f32.mrb[48].mxu1 }
 0x183   : > { %v2356_v49 = vpop.f32.mrb[51].mxu0  ;;  %v2433_v0 = vpop.f32.mrb[49].mxu1 }
 0x184   : > { %v2357_v61 = vadd.f32 %v2356_v49, %v2355_v19  ;;  %v2434_v2 = vadd.f32 %v2433_v0, %v2432_v30 }
 0x186   : > { %v1204_v4 = vadd.f32 %v2357_v61, %v3956_v33  ;;  %v2358_v24 = vpop.f32.mrb[52].mxu0  ;;  %v3996_v11 = vadd.f32 %v2434_v2, %v1195_v16  ;;  %v2435_v35 = vpop.f32.mrb[50].mxu1 }
 0x187   : > { %v2359_v36 = vpop.f32.mrb[53].mxu0  ;;  %v2436_v23 = vpop.f32.mrb[51].mxu1 }
 0x188   : > { %v2360_v48 = vadd.f32 %v2359_v36, %v2358_v24  ;;  %v2437_v26 = vadd.f32 %v2436_v23, %v2435_v35 }
 0x18a   : > { %v1213_v1 = vadd.f32 %v2360_v48, %v3958_v25  ;;  %v2361_v17 = vpop.f32.mrb[54].mxu0  ;;  %v3999_v18 = vadd.f32 %v2437_v26, %v1204_v4  ;;  %v2438_v54 = vpop.f32.mrb[52].mxu1 }
 0x18b   : > { %v2362_v58 = vpop.f32.mrb[55].mxu0  ;;  %v2439_v41 = vpop.f32.mrb[53].mxu1 }
 0x18c   : > { %v2363_v27 = vadd.f32 %v2362_v58, %v2361_v17  ;;  %v2440_v51 = vadd.f32 %v2439_v41, %v2438_v54 }
 0x18e   : > { %v1222_v33 = vadd.f32 %v2363_v27, %v3960_v21  ;;  %v2364_v10 = vpop.f32.mrb[56].mxu0  ;;  %v4002_v62 = vadd.f32 %v2440_v51, %v1213_v1  ;;  %v2441_v15 = vpop.f32.mrb[54].mxu1 }
 0x18f   : > { %v2365_v28 = vpop.f32.mrb[57].mxu0  ;;  %v2442_v29 = vpop.f32.mrb[55].mxu1 }
 0x190   : > { %v2366_v32 = vadd.f32 %v2365_v28, %v2364_v10  ;;  %v2443_v57 = vadd.f32 %v2442_v29, %v2441_v15 }
 0x192   : > { %v1231_v25 = vadd.f32 %v2366_v32, %v3962_v20  ;;  %v2367_v12 = vpop.f32.mrb[58].mxu0  ;;  %v4005_v5 = vadd.f32 %v2443_v57, %v1222_v33  ;;  %v2444_v3 = vpop.f32.mrb[56].mxu1 }
 0x193   : > { %v2368_v55 = vpop.f32.mrb[59].mxu0  ;;  %v2445_v37 = vpop.f32.mrb[57].mxu1 }
 0x194   : > { %v2369_v9 = vadd.f32 %v2368_v55, %v2367_v12  ;;  %v2446_v43 = vadd.f32 %v2445_v37, %v2444_v3 }
 0x196   : > { %v1240_v21 = vadd.f32 %v2369_v9, %v3964_v40  ;;  %v2370_v50 = vpop.f32.mrb[60].mxu0  ;;  %v4008_v53 = vadd.f32 %v2446_v43, %v1231_v25  ;;  %v2447_v34 = vpop.f32.mrb[58].mxu1 }
 0x197   : > { %v2371_v14 = vpop.f32.mrb[61].mxu0  ;;  %v2448_v7 = vpop.f32.mrb[59].mxu1 }
 0x198   : > { %v2372_v59 = vadd.f32 %v2371_v14, %v2370_v50  ;;  %v2449_v56 = vadd.f32 %v2448_v7, %v2447_v34 }
 0x19a   : > { %v1249_v20 = vadd.f32 %v2372_v59, %v3966_v13  ;;  %v2373_v47 = vpop.f32.mrb[62].mxu0  ;;  %v4011_v6 = vadd.f32 %v2449_v56, %v1240_v21  ;;  %v2450_v31 = vpop.f32.mrb[60].mxu1 }
 0x19b   : > { %v2374_v44 = vpop.f32.mrb[63].mxu0  ;;  %v2451_v8 = vpop.f32.mrb[61].mxu1 }
 0x19c   : > { %v2375_v16 = vadd.f32 %v2374_v44, %v2373_v47  ;;  %v2452_v19 = vadd.f32 %v2451_v8, %v2450_v31 }
 0x19e   : > { %v1258_v40 = vadd.f32 %v2375_v16, %v3969_v38  ;;  %v2488_v30 = vpop.f32.mrb[64].mxu0  ;;  %v4014_v49 = vadd.f32 %v2452_v19, %v1249_v20  ;;  %v2453_v0 = vpop.f32.mrb[62].mxu1 }
 0x19f   : > { %v2489_v61 = vpop.f32.mrb[65].mxu0  ;;  %v2454_v2 = vpop.f32.mrb[63].mxu1 }
 0x1a0   : > { %v2490_v4 = vadd.f32 %v2489_v61, %v2488_v30  ;;  %v2455_v24 = vadd.f32 %v2454_v2, %v2453_v0 }
 0x1a2   : > { %v1699_v13 = vadd.f32 %v2490_v4, %v3972_v42  ;;  %v2491_v35 = vpop.f32.mrb[66].mxu0  ;;  %v4017_v36 = vadd.f32 %v2455_v24, %v1258_v40  ;;  %v2568_v23 = vpop.f32.mrb[64].mxu1 }
 0x1a3   : > { %v2492_v48 = vpop.f32.mrb[67].mxu0  ;;  %v2569_v26 = vpop.f32.mrb[65].mxu1 }
 0x1a4   : > { %v2493_v1 = vadd.f32 %v2492_v48, %v2491_v35  ;;  %v2570_v17 = vadd.f32 %v2569_v26, %v2568_v23 }
 0x1a6   : > { %v1706_v38 = vadd.f32 %v2493_v1, %v3975_v22  ;;  %v2494_v42 = vpop.f32.mrb[68].mxu0  ;;  %v1908_v54 = vadd.f32 %v2570_v17, %v1699_v13  ;;  %v2571_v58 = vpop.f32.mrb[66].mxu1 }
 0x1a7   : > { %v2495_v41 = vpop.f32.mrb[69].mxu0  ;;  %v2572_v27 = vpop.f32.mrb[67].mxu1 }
 0x1a8   : > { %v2496_v51 = vadd.f32 %v2495_v41, %v2494_v42  ;;  %2017 = vst.msk [vmem:[%s4023_s8] sm:$0xff] %vm2016_vm0, %v1908_v54  ;;  %v2573_v33 = vadd.f32 %v2572_v27, %v2571_v58 }
 0x1aa   : > { %v1713_v10 = vadd.f32 %v2496_v51, %v3978_v63  ;;  %v2497_v15 = vpop.f32.mrb[70].mxu0  ;;  %v1915_v28 = vadd.f32 %v2573_v33, %v1706_v38  ;;  %v2574_v29 = vpop.f32.mrb[68].mxu1 }
 0x1ab   : > { %v2498_v32 = vpop.f32.mrb[71].mxu0  ;;  %v2575_v57 = vpop.f32.mrb[69].mxu1 }
 0x1ac   : > { %v2499_v25 = vadd.f32 %v2498_v32, %v2497_v15  ;;  %2018 = vst.msk [vmem:[%s4023_s8 + $0x8] sm:$0xff] %vm2016_vm0, %v1915_v28  ;;  %v2576_v22 = vadd.f32 %v2575_v57, %v2574_v29 }
 0x1ae   : > { %v1720_v12 = vadd.f32 %v2499_v25, %v3981_v52  ;;  %v2500_v3 = vpop.f32.mrb[72].mxu0  ;;  %v1922_v55 = vadd.f32 %v2576_v22, %v1713_v10  ;;  %v2577_v37 = vpop.f32.mrb[70].mxu1 }
 0x1af   : > { %v2501_v9 = vpop.f32.mrb[73].mxu0  ;;  %v2578_v43 = vpop.f32.mrb[71].mxu1 }
 0x1b0   : > { %v2502_v21 = vadd.f32 %v2501_v9, %v2500_v3  ;;  %2019 = vst.msk [vmem:[%s4023_s8 + $0x10] sm:$0xff] %vm2016_vm0, %v1922_v55  ;;  %v2579_v63 = vadd.f32 %v2578_v43, %v2577_v37 }
 0x1b2   : > { %v1727_v50 = vadd.f32 %v2502_v21, %v3984_v45  ;;  %v2503_v34 = vpop.f32.mrb[74].mxu0  ;;  %v1929_v14 = vadd.f32 %v2579_v63, %v1720_v12  ;;  %v2580_v7 = vpop.f32.mrb[72].mxu1 }
 0x1b3   : > { %v2504_v59 = vpop.f32.mrb[75].mxu0  ;;  %v2581_v56 = vpop.f32.mrb[73].mxu1 }
 0x1b4   : > { %v2505_v20 = vadd.f32 %v2504_v59, %v2503_v34  ;;  %2020 = vst.msk [vmem:[%s4023_s8 + $0x18] sm:$0xff] %vm2016_vm0, %v1929_v14  ;;  %v2582_v52 = vadd.f32 %v2581_v56, %v2580_v7 }
 0x1b6   : > { %v1734_v47 = vadd.f32 %v2505_v20, %v3987_v39  ;;  %v2506_v31 = vpop.f32.mrb[76].mxu0  ;;  %v1936_v44 = vadd.f32 %v2582_v52, %v1727_v50  ;;  %v2583_v8 = vpop.f32.mrb[74].mxu1 }
 0x1b7   : > { %v2507_v16 = vpop.f32.mrb[77].mxu0  ;;  %v2584_v19 = vpop.f32.mrb[75].mxu1 }
 0x1b8   : > { %v2508_v40 = vadd.f32 %v2507_v16, %v2506_v31  ;;  %2021 = vst.msk [vmem:[%s4023_s8 + $0x20] sm:$0xff] %vm2016_vm0, %v1936_v44  ;;  %v2585_v45 = vadd.f32 %v2584_v19, %v2583_v8 }
 0x1ba   : > { %v1741_v30 = vadd.f32 %v2508_v40, %v3990_v46  ;;  %v2509_v0 = vpop.f32.mrb[78].mxu0  ;;  %v1943_v61 = vadd.f32 %v2585_v45, %v1734_v47  ;;  %v2586_v2 = vpop.f32.mrb[76].mxu1 }
 0x1bb   : > { %v2510_v4 = vpop.f32.mrb[79].mxu0  ;;  %v2587_v24 = vpop.f32.mrb[77].mxu1 }
 0x1bc   : > { %v2511_v13 = vadd.f32 %v2510_v4, %v2509_v0  ;;  %2022 = vst.msk [vmem:[%s4023_s8 + $0x28] sm:$0xff] %vm2016_vm0, %v1943_v61  ;;  %v2588_v39 = vadd.f32 %v2587_v24, %v2586_v2 }
 0x1be   : > { %v1748_v35 = vadd.f32 %v2511_v13, %v3993_v60  ;;  %v2512_v23 = vpop.f32.mrb[80].mxu0  ;;  %v1950_v48 = vadd.f32 %v2588_v39, %v1741_v30  ;;  %v2589_v26 = vpop.f32.mrb[78].mxu1 }
 0x1bf   : > { %v2513_v1 = vpop.f32.mrb[81].mxu0  ;;  %v2590_v17 = vpop.f32.mrb[79].mxu1 }
 0x1c0   : > { %v2514_v38 = vadd.f32 %v2513_v1, %v2512_v23  ;;  %2023 = vst.msk [vmem:[%s4023_s8 + $0x30] sm:$0xff] %vm2016_vm0, %v1950_v48  ;;  %v2591_v46 = vadd.f32 %v2590_v17, %v2589_v26 }
 0x1c2   : > { %v1755_v42 = vadd.f32 %v2514_v38, %v3996_v11  ;;  %v2515_v54 = vpop.f32.mrb[82].mxu0  ;;  %v1957_v58 = vadd.f32 %v2591_v46, %v1748_v35  ;;  %v2592_v41 = vpop.f32.mrb[80].mxu1 }
 0x1c3   : > { %v2516_v27 = vpop.f32.mrb[83].mxu0  ;;  %v2593_v51 = vpop.f32.mrb[81].mxu1 }
 0x1c4   : > { %v2517_v33 = vadd.f32 %v2516_v27, %v2515_v54  ;;  %2024 = vst.msk [vmem:[%s4023_s8 + $0x38] sm:$0xff] %vm2016_vm0, %v1957_v58  ;;  %v2594_v60 = vadd.f32 %v2593_v51, %v2592_v41 }
 0x1c6   : > { %v1762_v10 = vadd.f32 %v2517_v33, %v3999_v18  ;;  %v2518_v15 = vpop.f32.mrb[84].mxu0  ;;  %v1964_v28 = vadd.f32 %v2594_v60, %v1755_v42  ;;  %v2595_v29 = vpop.f32.mrb[82].mxu1 }
 0x1c7   : > { %v2519_v32 = vpop.f32.mrb[85].mxu0  ;;  %v2596_v57 = vpop.f32.mrb[83].mxu1 }
 0x1c8   : > { %v2520_v25 = vadd.f32 %v2519_v32, %v2518_v15  ;;  %2025 = vst.msk [vmem:[%s4023_s8 + $0x40] sm:$0xff] %vm2016_vm0, %v1964_v28  ;;  %v2597_v11 = vadd.f32 %v2596_v57, %v2595_v29 }
 0x1ca   : > { %v1769_v22 = vadd.f32 %v2520_v25, %v4002_v62  ;;  %v2521_v12 = vpop.f32.mrb[86].mxu0  ;;  %v1971_v3 = vadd.f32 %v2597_v11, %v1762_v10  ;;  %v2598_v55 = vpop.f32.mrb[84].mxu1 }
 0x1cb   : > { %v2522_v37 = vpop.f32.mrb[87].mxu0  ;;  %v2599_v9 = vpop.f32.mrb[85].mxu1 }
 0x1cc   : > { %v2523_v43 = vadd.f32 %v2522_v37, %v2521_v12  ;;  %2026 = vst.msk [vmem:[%s4023_s8 + $0x48] sm:$0xff] %vm2016_vm0, %v1971_v3  ;;  %v2600_v18 = vadd.f32 %v2599_v9, %v2598_v55 }
 0x1ce   : > { %v1776_v21 = vadd.f32 %v2523_v43, %v4005_v5  ;;  %v2524_v63 = vpop.f32.mrb[88].mxu0  ;;  %v1978_v50 = vadd.f32 %v2600_v18, %v1769_v22  ;;  %v2601_v34 = vpop.f32.mrb[86].mxu1 }
 0x1cf   : > { %v2525_v14 = vpop.f32.mrb[89].mxu0  ;;  %v2602_v7 = vpop.f32.mrb[87].mxu1 }
 0x1d0   : > { %v2526_v59 = vadd.f32 %v2525_v14, %v2524_v63  ;;  %2027 = vst.msk [vmem:[%s4023_s8 + $0x50] sm:$0xff] %vm2016_vm0, %v1978_v50  ;;  %v2603_v62 = vadd.f32 %v2602_v7, %v2601_v34 }
 0x1d2   : > { %v1783_v56 = vadd.f32 %v2526_v59, %v4008_v53  ;;  %v2527_v20 = vpop.f32.mrb[90].mxu0  ;;  %v1985_v52 = vadd.f32 %v2603_v62, %v1776_v21  ;;  %v2604_v47 = vpop.f32.mrb[88].mxu1 }
 0x1d3   : > { %v2528_v31 = vpop.f32.mrb[91].mxu0  ;;  %v2605_v44 = vpop.f32.mrb[89].mxu1 }
 0x1d4   : > { %v2529_v8 = vadd.f32 %v2528_v31, %v2527_v20  ;;  %2028 = vst.msk [vmem:[%s4023_s8 + $0x58] sm:$0xff] %vm2016_vm0, %v1985_v52  ;;  %v2606_v5 = vadd.f32 %v2605_v44, %v2604_v47 }
 0x1d6   : > { %v1790_v16 = vadd.f32 %v2529_v8, %v4011_v6  ;;  %v2530_v19 = vpop.f32.mrb[92].mxu0  ;;  %v1992_v40 = vadd.f32 %v2606_v5, %v1783_v56  ;;  %v2607_v45 = vpop.f32.mrb[90].mxu1 }
 0x1d7   : > { %v2531_v30 = vpop.f32.mrb[93].mxu0  ;;  %v2608_v0 = vpop.f32.mrb[91].mxu1 }
 0x1d8   : > { %v2532_v61 = vadd.f32 %v2531_v30, %v2530_v19  ;;  %2029 = vst.msk [vmem:[%s4023_s8 + $0x60] sm:$0xff] %vm2016_vm0, %v1992_v40  ;;  %v2609_v53 = vadd.f32 %v2608_v0, %v2607_v45 }
 0x1da   : > { %v1797_v2 = vadd.f32 %v2532_v61, %v4014_v49  ;;  %v2533_v4 = vpop.f32.mrb[94].mxu0  ;;  %v1999_v24 = vadd.f32 %v2609_v53, %v1790_v16  ;;  %v2610_v13 = vpop.f32.mrb[92].mxu1 }
 0x1db   : > { %v2534_v39 = vpop.f32.mrb[95].mxu0  ;;  %v2611_v35 = vpop.f32.mrb[93].mxu1 }
 0x1dc   : > { %v2535_v6 = vadd.f32 %v2534_v39, %v2533_v4  ;;  %2030 = vst.msk [vmem:[%s4023_s8 + $0x68] sm:$0xff] %vm2016_vm0, %v1999_v24  ;;  %v2612_v23 = vadd.f32 %v2611_v35, %v2610_v13 }
 0x1de   : > { %v1804_v48 = vadd.f32 %v2535_v6, %v4017_v36  ;;  %v2006_v26 = vadd.f32 %v2612_v23, %v1797_v2  ;;  %v2613_v1 = vpop.f32.mrb[94].mxu1 }
 0x1df   : > { %v2614_v17 = vpop.f32.mrb[95].mxu1 }
 0x1e0   : > { %2031 = vst.msk [vmem:[%s4023_s8 + $0x70] sm:$0xff] %vm2016_vm0, %v2006_v26  ;;  %v2615_v38 = vadd.f32 %v2614_v17, %v2613_v1 }
 0x1e2   : > { %v2013_v46 = vadd.f32 %v2615_v38, %v1804_v48 }
 0x1e4   : > { %2032 = vst.msk [vmem:[%s4023_s8 + $0x78] sm:$0xff] %vm2016_vm0, %v2013_v46 }
 0x1e5 PF: > { %s12_s11 = sadd.s32 1, %s2854_s11   ;;  %s4475_s9 = smov %s2850_s10 }
 0x1e6   : > { %p9_p5 = scmp.ge.s32.totalorder %s12_s11, 4   ;;  %s4476_s10 = smov %s4478_s12 }
 0x1e8   :  { %11 = sbr.rel (!%p9_p5) target bundleno = 2 (0x2), region = 58 }

</bundles_post_ra>
